<compile_context>
chip_gen: v6e
topology: v6e:2x2x1
jax: 0.10.0
libtpu: 0.0.40
codegen_flags: <defaults>
</compile_context>

<pallas_src>
import functools

import jax
import jax.numpy as jnp
from jax import lax
from jax.experimental import pallas as pl
from jax.experimental.pallas import tpu as pltpu


def _cntrst_rows_kernel(tp_ref, out_ref, *, tm, pos_size, precision):
    """tp_ref : (2P, D) full total_pos, resident in VMEM across all grid steps.
       out_ref: (1, TM) lane-dense per-row loss terms log(denom_r) - pos_logit_r
                for the TM rows owned by this grid step."""
    n2 = 2 * pos_size
    i = pl.program_id(0)
    start = i * tm
    if tm % 8 == 0:
        start = pl.multiple_of(start, 8)       # aligned sublane slice of the resident copy

    tp_all = tp_ref[...]                        # (2P, D)
    tp_blk = tp_ref[pl.ds(start, tm), :]        # (TM, D) — sliced in-kernel, no 2nd input

    # S^T[j, r] = <total_pos[j], tp_blk[r]>  -> (2P, TM).  Contraction over D feeds the
    # MXU directly (no materialized transpose); keeping the block-row index on the LANE
    # axis makes every later reduction land in the lane-dense (1, TM) output layout.
    s = lax.dot_general(
        tp_all, tp_blk,
        dimension_numbers=(((1,), (1,)), ((), ())),
        preferred_element_type=jnp.float32,
        precision=precision,
    )

    j_idx = lax.broadcasted_iota(jnp.int32, (n2, tm), 0)           # global index j over all rows
    g_row = start + lax.broadcasted_iota(jnp.int32, (n2, tm), 1)   # global row of each lane/column
    diag = j_idx == g_row

    # Positive partner column: pos_logit[g] == S[g, (g + P) mod 2P]  (avoid vector rem).
    partner_col = g_row + pos_size
    partner_col = jnp.where(partner_col >= n2, partner_col - n2, partner_col)
    partner = j_idx == partner_col

    # Stable masked log-sum-exp of the OFF-DIAGONAL similarities: shift by the column
    # max, zero the diagonal term of the exp (no post-hoc subtraction -> no cancellation).
    m = jnp.max(s, axis=0, keepdims=True)                                        # (1, TM)
    ssum = jnp.sum(jnp.where(diag, 0.0, jnp.exp(s - m)), axis=0, keepdims=True)  # (1, TM)
    log_denom = m + jnp.log(ssum)

    # Positive-pair logit pulled straight out of the Gram block (VPU select + XLU reduce).
    pos_logit = jnp.sum(jnp.where(partner, s, 0.0), axis=0, keepdims=True)       # (1, TM)

    # -log(pos / denom) == log(denom) - pos_logit  (the exp / divide cancel).
    out_ref[...] = (log_denom - pos_logit).astype(out_ref.dtype)


def _pick_row_tile(n2, block_rows):
    """Row-tile TM: must divide 2P and (because the lane-dense output block is (1, TM))
    be a multiple of 128, else fall back to the full extent.  Default 128 keeps >= 2 grid
    steps at 2P >= 256 so the "parallel" row axis can split across v7x's 2 TensorCores;
    on v6e/v5e the extra ~0.35 us grid step is noise at these sizes."""
    for cand in (block_rows, 512, 256, 128):
        if cand <= n2 and cand % 128 == 0 and n2 % cand == 0:
            return cand
    return n2  # tiny / ragged case: one full-extent block (always legal)


def _extract_positive_pairs(src_feas, src_labels, tgt_feas, tgt_logits, delta, pos_size):
    # TODO(synk): `extract_positive_pairs` is NOT defined in the reference module; this is
    # a deterministic stand-in: pick the `pos_size` most-confident targets (softmax
    # max-prob, argsort order) paired with the first `pos_size` source samples.
    probs = jax.nn.softmax(tgt_logits, axis=-1)
    conf = jnp.max(probs, axis=-1)
    tgt_index = jnp.argsort(-conf)[:pos_size]
    src_index = jnp.arange(pos_size)
    del src_feas, src_labels, delta
    return src_index, tgt_index


def my_cntrst_loss_forward(src_feas, src_labels, tgt_feas, tgt_logits, delta=0.9,
                           *, block_rows=128, use_bf16_matmul=False):
    """Mirrors my_cntrst_loss.forward.  Returns (nce, loss): `nce` (== 0) is what the
    PyTorch forward actually returns; `loss` is the internally-computed (and discarded)
    contrastive loss, with its hot path (Gram matmul / exp / masked row-LSE / log) in
    Pallas."""
    d = src_feas.shape[1]
    # The reference's cat([z_i (P,D), z_j (D,P)]) is only shape-valid when P == D.
    pos_size = d
    assert src_feas.shape[0] >= pos_size and tgt_feas.shape[0] >= pos_size, (
        "batch must be >= feature_dim for the reference construction (P == D)")

    src_index, tgt_index = _extract_positive_pairs(
        src_feas, src_labels, tgt_feas, tgt_logits, delta, pos_size)

    z_i = src_feas[src_index]                          # (P, D)
    z_j = tgt_feas[tgt_index].T                        # (D, P)  == .permute(1, 0)
    total_pos = jnp.concatenate([z_i, z_j], axis=0)    # (2P, D)

    n2 = 2 * pos_size
    tm = _pick_row_tile(n2, block_rows)
    grid = (n2 // tm,)

    if use_bf16_matmul:
        # v6e/v7x MXU is bf16-native: cast ONCE here (halves DMA + resident VMEM, removes
        # the per-step in-kernel cast); accumulation stays f32.  Relax tolerances if used.
        tp_in = total_pos.astype(jnp.bfloat16)
        precision = None
    else:
        tp_in = total_pos.astype(jnp.float32)
        precision = lax.Precision.HIGHEST   # full f32 accuracy to match the f32 reference

    elem = jnp.dtype(tp_in.dtype).itemsize
    # Resident operand (double-buffered by the default pipeline) + (2P, TM) f32 S tile
    # and its exp/select temporaries.
    vmem_est = 2 * n2 * d * elem + 4 * n2 * tm * 4
    vmem_limit = None
    if vmem_est > (12 << 20):   # v5e default scoped VMEM is only 16 MiB
        vmem_limit = int(min(max(2 * vmem_est, 32 << 20), 64 << 20))
    # TODO(synk): for D >~ 2k the resident (2P, D) operand outgrows v7x's 64 MiB VMEM;
    # switch to a column-tiled flash-style variant (running max/sum scratch, column axis
    # "arbitrary") and/or single-buffer the resident spec with pipeline_mode=pl.Buffered(1).

    cost = pl.CostEstimate(
        flops=2 * n2 * n2 * d,
        transcendentals=n2 * n2 + n2,
        bytes_accessed=elem * n2 * d + 4 * n2,
    )

    kernel = functools.partial(_cntrst_rows_kernel, tm=tm, pos_size=pos_size,
                               precision=precision)

    per_row = pl.pallas_call(
        kernel,
        out_shape=jax.ShapeDtypeStruct((1, n2), jnp.float32),   # lane-dense per-row terms
        grid_spec=pltpu.PrefetchScalarGridSpec(
            num_scalar_prefetch=0,
            grid=grid,
            in_specs=[
                # Single resident copy of total_pos; the row block is sliced from it
                # in-kernel, so there is no duplicated streamed input / extra DMA stream.
                pl.BlockSpec((n2, d), lambda i: (0, 0)),
            ],
            out_specs=pl.BlockSpec((1, tm), lambda i: (0, i)),
        ),
        compiler_params=pltpu.CompilerParams(
            dimension_semantics=("parallel",),       # independent row blocks (v7x megacore)
            vmem_limit_bytes=vmem_limit),
        cost_estimate=cost,
    )(tp_in)

    loss = jnp.mean(per_row)

    nce = 0  # the reference forward returns nce; the loss is computed then discarded
    return nce, loss


def _reference_loss(src_feas, src_labels, tgt_feas, tgt_logits, delta=0.9):
    """Pure-JAX port of the discarded reference loss (raw masked exp-sum), for a check."""
    d = src_feas.shape[1]
    src_index, tgt_index = _extract_positive_pairs(
        src_feas, src_labels, tgt_feas, tgt_logits, delta, d)
    z_i = src_feas[src_index]
    z_j = tgt_feas[tgt_index].T
    total_pos = jnp.concatenate([z_i, z_j], axis=0)
    sim = jnp.exp(jnp.matmul(total_pos, total_pos.T, precision=lax.Precision.HIGHEST))
    n2 = 2 * d
    mask = ~jnp.eye(n2, dtype=bool)
    denom = jnp.sum(jnp.where(mask, sim, 0.0), axis=-1)
    pos = jnp.exp(jnp.sum(z_i * z_j, axis=-1))
    pos = jnp.concatenate([pos, pos], axis=0)
    return jnp.mean(-jnp.log(pos / denom))


if __name__ == "__main__":
    key = jax.random.PRNGKey(0)
    k1, k2, k3, k4 = jax.random.split(key, 4)

    batch = 160
    feat_dim = 128       # pos_size == feat_dim (reference construction requires P == D)
    num_classes = 4
    delta = 0.9

    # Scale features so the reference's unshifted exp(sim) stays finite in f32.
    src_feas = 0.3 * jax.random.normal(k1, (batch, feat_dim), dtype=jnp.float32)
    tgt_feas = 0.3 * jax.random.normal(k2, (batch, feat_dim), dtype=jnp.float32)
    src_labels = jax.random.randint(k3, (batch,), 0, num_classes, dtype=jnp.int32)
    tgt_logits = jax.random.normal(k4, (batch, num_classes), dtype=jnp.float32)

    # block_rows=128 -> 2P=256 rows split into a 2-step "parallel" grid (v7x-friendly).
    nce, loss = my_cntrst_loss_forward(
        src_feas, src_labels, tgt_feas, tgt_logits, delta, block_rows=128)
    loss = jax.block_until_ready(loss)

    ref = jax.block_until_ready(
        _reference_loss(src_feas, src_labels, tgt_feas, tgt_logits, delta))

    assert nce == 0
    assert jnp.allclose(loss, ref, rtol=1e-5, atol=1e-5), (loss, ref)

    print("KERNEL_OK")
</pallas_src>

<mosaic_0001>
module attributes {stable_mosaic.version = 11 : i64} {
  func.func @_cntrst_rows_kernel(%arg0: i32, %arg1: memref<256x128xf32, #tpu.memory_space<vmem>>, %arg2: memref<1x128xf32, #tpu.memory_space<vmem>>) attributes {dimension_semantics = [#tpu.dimension_semantics<parallel>], iteration_bounds = array<i64: 2>, scalar_prefetch = 0 : i64, scratch_operands = 0 : i64, tpu.core_type = #tpu.core_type<tc>, window_params = [{pipeline_mode = #tpu.pipeline_mode<synchronous>, transform_indices = @transform_0, window_bounds = array<i64: 256, 128>}, {transform_indices = @transform_1, window_bounds = array<i64: 1, 128>}]} {
    %c128_i32 = arith.constant 128 : i32
    %0 = arith.muli %arg0, %c128_i32 : i32
    %1 = tpu.assume_multiple %0, 8 : i32
    %c0 = arith.constant 0 : index
    %c0_0 = arith.constant 0 : index
    %2 = vector.load %arg1[%c0, %c0_0] : memref<256x128xf32, #tpu.memory_space<vmem>>, vector<256x128xf32>
    %3 = arith.index_cast %1 : i32 to index
    %c0_1 = arith.constant 0 : index
    %4 = vector.load %arg1[%3, %c0_1] : memref<256x128xf32, #tpu.memory_space<vmem>>, vector<128x128xf32>
    %cst = arith.constant dense<0.000000e+00> : vector<256x128xf32>
    %5 = tpu.matmul %2, %4, %cst {dimension_numbers = #tpu.dot_dimension_numbers<[1], [1], [0], [0], [0, 0, 1, 0], [], []>, precision = #tpu.contract_precision<fp32>} : vector<256x128xf32>, vector<128x128xf32>, vector<256x128xf32> -> vector<256x128xf32>
    %6 = tpu.iota {dimensions = array<i32: 0>} : vector<256x128xi32>
    %7 = tpu.iota {dimensions = array<i32: 1>} : vector<256x128xi32>
    %8 = vector.broadcast %1 : i32 to vector<256x128xi32>
    %9 = arith.addi %8, %7 : vector<256x128xi32>
    %10 = arith.cmpi eq, %6, %9 : vector<256x128xi32>
    %c128_i32_2 = arith.constant 128 : i32
    %11 = vector.broadcast %c128_i32_2 : i32 to vector<256x128xi32>
    %12 = arith.addi %9, %11 : vector<256x128xi32>
    %c256_i32 = arith.constant 256 : i32
    %13 = vector.broadcast %c256_i32 : i32 to vector<256x128xi32>
    %14 = arith.cmpi sge, %12, %13 : vector<256x128xi32>
    %c256_i32_3 = arith.constant 256 : i32
    %15 = vector.broadcast %c256_i32_3 : i32 to vector<256x128xi32>
    %16 = arith.subi %12, %15 : vector<256x128xi32>
    %17 = arith.select %14, %16, %12 : vector<256x128xi1>, vector<256x128xi32>
    %18 = arith.cmpi eq, %6, %17 : vector<256x128xi32>
    %cst_4 = arith.constant dense<0xFF800000> : vector<128xf32>
    %19 = vector.multi_reduction <maximumf>, %5, %cst_4 [0] : vector<256x128xf32> to vector<128xf32>
    %20 = vector.shape_cast %19 : vector<128xf32> to vector<1x128xf32>
    %21 = vector.broadcast %20 : vector<1x128xf32> to vector<256x128xf32>
    %22 = arith.subf %5, %21 : vector<256x128xf32>
    %23 = math.exp %22 : vector<256x128xf32>
    %cst_5 = arith.constant 0.000000e+00 : f32
    %24 = vector.broadcast %cst_5 : f32 to vector<256x128xf32>
    %25 = arith.select %10, %24, %23 : vector<256x128xi1>, vector<256x128xf32>
    %cst_6 = arith.constant dense<0.000000e+00> : vector<128xf32>
    %26 = vector.multi_reduction <add>, %25, %cst_6 [0] : vector<256x128xf32> to vector<128xf32>
    %27 = vector.shape_cast %26 : vector<128xf32> to vector<1x128xf32>
    %28 = math.log %27 : vector<1x128xf32>
    %29 = arith.addf %20, %28 : vector<1x128xf32>
    %cst_7 = arith.constant 0.000000e+00 : f32
    %30 = vector.broadcast %cst_7 : f32 to vector<256x128xf32>
    %31 = arith.select %18, %5, %30 : vector<256x128xi1>, vector<256x128xf32>
    %cst_8 = arith.constant dense<0.000000e+00> : vector<128xf32>
    %32 = vector.multi_reduction <add>, %31, %cst_8 [0] : vector<256x128xf32> to vector<128xf32>
    %33 = vector.shape_cast %32 : vector<128xf32> to vector<1x128xf32>
    %34 = arith.subf %29, %33 : vector<1x128xf32>
    %c0_9 = arith.constant 0 : index
    %c0_10 = arith.constant 0 : index
    %35 = vector.load %arg2[%c0_9, %c0_10] : memref<1x128xf32, #tpu.memory_space<vmem>>, vector<1x128xf32>
    tpu.vector_store %arg2[%c0_9, %c0_10], %34 {strides = array<i32>} : memref<1x128xf32, #tpu.memory_space<vmem>>, vector<1x128xf32>,
    return
  }
  func.func @transform_0(%arg0: i32) -> (i32, i32) {
    %c0_i32 = arith.constant 0 : i32
    %c0_i32_0 = arith.constant 0 : i32
    %c0_i32_1 = arith.constant 0 : i32
    return %c0_i32, %c0_i32_0 : i32, i32
  }
  func.func @transform_1(%arg0: i32) -> (i32, i32) {
    %c0_i32 = arith.constant 0 : i32
    %c0_i32_0 = arith.constant 0 : i32
    return %c0_i32, %arg0 : i32, i32
  }
}

</mosaic_0001>

<bundles_post_ra>
// kernel: tpu_custom_call.1
= control target key start
LH: loop header
LB: loop body
LE: loop exit
PB: predicated region body
PF: predicated region fallthrough
CT: control target
= control target key end

     0   :  { %6 = vsyncpa [#allocation3], 0  ;;  %s5221_s0 = inlined_call_operand.hbm [shape: f32[256,128], index: 0, kind: input, shape index: {}]   ;;  %s5222_s1 = inlined_call_operand.hbm [shape: f32[1,256], index: 1, kind: output, shape index: {}]  }
   0x1   :  { %7 = vsyncpa [#allocation4], 0 }
   0x2   :  { %9 = vsyncpa [#allocation4 + $0x1], 0  ;;  %s3586_s6 = smov 0   ;;  %s3588_s7 = smov 0  }
   0x3   :  { %s3590_s8 = smov 0   ;;  %s3592_s9 = smov 0  }
   0x4 LB: > { %s3607_s10 = sadd.s32 4294967295, %s3570_s9   ;;  %s2584_s11 = sadd.s32 4294967294, %s3570_s9   ;;  %s3570_s9 = sphi %s3592_s9, %s5563_s9   ;;  %s3566_s8 = sphi %s3590_s8, %s5562_s8   ;;  %s3562_s7 = sphi %s3588_s7, %s5561_s7   ;;  %s3558_s6 = sphi %s3586_s6, %s5560_s6  }
   0x5   : > { %s3611_s12 = sadd.s32 1, %s3570_s9   ;;  %s43_s13 = sadd.s32 1, %s3566_s8 }
   0x6   : > { %s40_s14 = ssub.s32 %s3570_s9, %s3611_s12  ;;  %p53_p0 = scmp.ne.s32.totalorder %s3566_s8, %s3562_s7 }
   0x7   : > { %p41_p1 = scmp.eq.s32.totalorder %s40_s14, 0  ;;  %p54_p2 = scmp.eq.s32.totalorder %s3607_s10, 1 }
   0x8   : > { %p59_p3 = scmp.ne.s32.totalorder %s3562_s7, %s3558_s6  ;;  %p60_p4 = scmp.eq.s32.totalorder %s2584_s11, 1 }
   0x9   : > { %s3622_s15 = scalar_select %p41_p1, %s3566_s8, %s43_s13  }
   0xa   : > { %p3624_p5 = por %p54_p2, %p53_p0  ;;  %p3628_p6 = por %p60_p4, %p59_p3 }
   0xb   : > { %p2585_p7 = scmp.ge.s32.totalorder %s3570_s9, 1  ;;  %p67_p8 = scmp.lt.s32.totalorder %s3570_s9, 3 }
   0xc   : > { %s5361_s17 = scalar_select %p3628_p6, 1, 0 }
   0xd   : > { %p3376_p9 = scmp.eq.s32.totalorder %s3607_s10, 0  ;;  %p3635_p10 = pnand %p2585_p7, %p67_p8 }
   0xe   : > { %s3572_s19 = smov [#allocation2]  }
   0xf   : > { %s79_s20 = sshll.u32 %s3572_s19, 4  ;;  %p3368_p11 = pneg %p3635_p10  ;;  %s80_s20 = int_to_ptr.vmem [resolvable:$true] %s79_s20 }
  0x10   : > { %s3491_s21 = scalar_lea.vmem %s80_s20, 4096  ;;  %p3499_p3 = scmp.lt.s32.totalorder %s80_s20, %s80_s20 }
  0x11   : > { %p3369_p12 = pnand %p3376_p9, %p3368_p11  ;;  %p3492_p0 = scmp.ne.s32.totalorder %s80_s20, %s3491_s21 }
  0x12   : > { %p3500_p4 = scmp.lt.s32.totalorder %s3491_s21, %s3491_s21 }
  0x13   : > { %p3482_p13 = pneg %p3369_p12 }
  0x14   : > { %p3501_p6 = por %p3500_p4, %p3499_p3 }
  0x15   : > { %p3494_p1 = pnand %p3492_p0, %p3482_p13 }
  0x17   : > { %p3495_p2 = pneg %p3494_p1 }
  0x19   : > { %p3502_p7 = pnand %p3501_p6, %p3495_p2 }
  0x1b   : > { %3505 = shalt.err (!%p3502_p7)
}
  0x1c   : > { %s3573_s22 = smov 128   ;;  %s3574_s23 = smov 8  }
  0x1d   : > { %3371 = dma.hbm_to_vmem [thread:$0]  (!%p3369_p12), %s5221_s0, 4096, %s80_s20, [#allocation3], %s3573_s22, %s3573_s22, %s3574_s23  }
  0x1e   : > { %95 = sbr.rel (%p3635_p10) target bundleno = 643 (0x283), region = 24 }
  0x23   : > { %3549 = dma.done.wait (%p3376_p9), [#allocation3], 4096  }
  0x24   : > { %3551 = vsyncadd (%p3376_p9), [#allocation3], 4294963200  ;;  %s2589_s26 = sshll.u32 %s3607_s10, 7  ;;  %v110_v33 = vld [vmem:[#allocation2] sm:$0xff]  ;;  %s107_s28 = sand.u32 1, %s3562_s7  }
  0x25   : > { %s3655_s27 = scalar_lea.vmem [#allocation2], %s2589_s26  ;;  %v3730_v35 = vand.u32 4294901760, %v110_v33  ;;  %s2591_s29 = sshll.u32 %s3607_s10, 4 }
  0x26   : > { %v158_v0 = vld [vmem:[%s3655_s27 + $0x78] sm:$0xff]  ;;  %v157_v1 = vld [vmem:[%s3655_s27 + $0x70] sm:$0xff]  ;;  %v156_v2 = vld [vmem:[%s3655_s27 + $0x68] sm:$0xff]  ;;  %s108_s30 = scalar_lea.vmem [#allocation5], %s107_s28  ;;  %s2525_s5 = scalar_lea.hbm %s5222_s1, %s2591_s29 }
  0x27   : > { %v3660_v3 = vand.u32 4294901760, %v158_v0  ;;  %v3662_v4 = vand.u32 4294901760, %v157_v1  ;;  %v3664_v5 = vand.u32 4294901760, %v156_v2  ;;  %v155_v6 = vld [vmem:[%s3655_s27 + $0x60] sm:$0xff]  ;;  %v154_v7 = vld [vmem:[%s3655_s27 + $0x58] sm:$0xff]  ;;  %v153_v16 = vld [vmem:[%s3655_s27 + $0x50] sm:$0xff]  ;;  %v3743_v41 = vsub.f32 %v110_v33, %v3730_v35  ;;  %2994 = vmatprep.mubr.f32.mxu1 %v3730_v35 }
  0x28   : > { %v3668_v8 = vand.u32 4294901760, %v155_v6  ;;  %v3681_v12 = vand.u32 4294901760, %v154_v7  ;;  %v3702_v20 = vand.u32 4294901760, %v153_v16  ;;  %v152_v26 = vld [vmem:[%s3655_s27 + $0x48] sm:$0xff]  ;;  %v151_v31 = vld [vmem:[%s3655_s27 + $0x40] sm:$0xff]  ;;  %5368 = vst [vmem:[#allocation13_spill] sm:$0xff] %v3730_v35 }
  0x29   : > { %2882 = vmatprep.subr.mxu0 %v3660_v3  ;;  %v3672_v9 = vsub.f32 %v158_v0, %v3660_v3  ;;  %v3675_v10 = vsub.f32 %v157_v1, %v3662_v4  ;;  %v3678_v11 = vsub.f32 %v156_v2, %v3664_v5  ;;  %v3715_v27 = vand.u32 4294901760, %v152_v26  ;;  %v150_v39 = vld [vmem:[%s3655_s27 + $0x38] sm:$0xff]  ;;  %5370 = vst [vmem:[#allocation15_spill] sm:$0xff] %v3743_v41  ;;  %v149_v47 = vld [vmem:[%s3655_s27 + $0x30] sm:$0xff]  ;;  %v148_v55 = vld [vmem:[%s3655_s27 + $0x28] sm:$0xff]  ;;  %s2527_s2 = sshll.u32 %s108_s30, 4  ;;  %s2528_s2 = int_to_ptr.vmem [resolvable:$true] %s2527_s2 }
  0x2a   : > { %2883 = vmatpush3.xpose.msra.mxu0 %v3660_v3  ;;  %v3695_v17 = vsub.f32 %v155_v6, %v3668_v8  ;;  %v3705_v21 = vsub.f32 %v154_v7, %v3681_v12  ;;  %v3725_v32 = vsub.f32 %v153_v16, %v3702_v20  ;;  %v3728_v34 = vand.u32 4294901760, %v151_v31  ;;  %v147_v61 = vld [vmem:[%s3655_s27 + $0x20] sm:$0xff]  ;;  %v146_v6 = vld [vmem:[%s3655_s27 + $0x18] sm:$0xff]  ;;  %s2515_s11 = scalar_lea.sflag [#allocation4], %s107_s28  ;;  %s3506_s13 = scalar_lea.vmem %s2528_s2, 16 }
  0x2b   : > { %2884 = vmatprep.subr.mxu0 %v3662_v4  ;;  %v3685_v13 = vand.u32 4294901760, %v3672_v9  ;;  %v3688_v14 = vand.u32 4294901760, %v3675_v10  ;;  %v3691_v15 = vand.u32 4294901760, %v3678_v11  ;;  %v3740_v40 = vsub.f32 %v152_v26, %v3715_v27  ;;  %p3507_p6 = scmp.ne.s32.totalorder %s2528_s2, %s3506_s13  ;;  %s3575_s14 = smov [#allocation5]  }
  0x2c   : > { %v3711_v25 = vand.u32 4294901760, %v3695_v17  ;;  %v3721_v30 = vand.u32 4294901760, %v3705_v21  ;;  %v3736_v38 = vand.u32 4294901760, %v3725_v32  ;;  %v3747_v42 = vand.u32 4294901760, %v150_v39  ;;  %s3510_s10 = sshll.u32 %s3575_s14, 4  ;;  %s3511_s10 = int_to_ptr.vmem [resolvable:$false] %s3510_s10 }
  0x2d   : > { %5363 = vst [vmem:[#allocation8_spill] sm:$0xff] %v3685_v13  ;;  %5364 = vst [vmem:[#allocation9_spill] sm:$0xff] %v3688_v14  ;;  %v564_v18 = vsub.f32 %v3672_v9, %v3685_v13  ;;  %v571_v19 = vsub.f32 %v3675_v10, %v3688_v14  ;;  %v578_v24 = vsub.f32 %v3678_v11, %v3691_v15  ;;  %v5223_v43 = vand.u32 4294901760, %v3743_v41  ;;  %p3508_p8 = pnand %p3507_p6, %p3624_p5  ;;  %s3512_s18 = scalar_lea.vmem %s3511_s10, 32 }
  0x2e   : > { %5365 = vst [vmem:[#allocation10_spill] sm:$0xff] %v3691_v15  ;;  %2885 = vmatpush3.xpose.msra.mxu0 %v3662_v4  ;;  %5366 = vst [vmem:[#allocation11_spill] sm:$0xff] %v3711_v25  ;;  %v585_v29 = vsub.f32 %v3695_v17, %v3711_v25  ;;  %v592_v37 = vsub.f32 %v3705_v21, %v3721_v30  ;;  %v599_v45 = vsub.f32 %v3725_v32, %v3736_v38  ;;  %v120_v15 = vld [vmem:[#allocation2 + $0x50] sm:$0xff]  ;;  %p3513_p10 = scmp.lt.s32.totalorder %s2528_s2, %s3511_s10  ;;  %p3514_p11 = scmp.lt.s32.totalorder %s3512_s18, %s3506_s13 }
  0x2f   : > { %2886 = vmatprep.subr.mxu0 %v3664_v5  ;;  %v565_v22 = vand.u32 4294901760, %v564_v18  ;;  %v572_v23 = vand.u32 4294901760, %v571_v19  ;;  %v579_v28 = vand.u32 4294901760, %v578_v24  ;;  %5367 = vst [vmem:[#allocation12_spill] sm:$0xff] %v3721_v30  ;;  %5369 = vst [vmem:[#allocation14_spill] sm:$0xff] %v3736_v38  ;;  %v3754_v46 = vand.u32 4294901760, %v3740_v40  ;;  %p3509_p9 = pneg %p3508_p8 }
  0x30   : > { %v586_v36 = vand.u32 4294901760, %v585_v29  ;;  %v593_v44 = vand.u32 4294901760, %v592_v37  ;;  %v3758_v48 = vsub.f32 %v151_v31, %v3728_v34  ;;  %v243_v49 = vsub.f32 %v3743_v41, %v5223_v43  ;;  %v121_v30 = vld [vmem:[#allocation2 + $0x58] sm:$0xff]  ;;  %v123_v41 = vld [vmem:[#allocation2 + $0x68] sm:$0xff]  ;;  %p3515_p12 = por %p3514_p11, %p3513_p10 }
  0x31   : > { %2962 = vmatprep.subr.mxu1 %v565_v22  ;;  %5371 = vst [vmem:[#allocation16_spill] sm:$0xff] %v3754_v46  ;;  %v3764_v50 = vand.u32 4294901760, %v149_v47  ;;  %v600_v52 = vand.u32 4294901760, %v599_v45  ;;  %v606_v53 = vsub.f32 %v3740_v40, %v3754_v46  ;;  %v3774_v56 = vsub.f32 %v150_v39, %v3747_v42  ;;  %v111_v39 = vld [vmem:[#allocation2 + $0x8] sm:$0xff] }
  0x32   : > { %2887 = vmatpush3.xpose.msra.mxu0 %v3664_v5  ;;  %2963 = vmatpush3.xpose.msra.mxu1 %v565_v22  ;;  %v244_v51 = vand.u32 4294901760, %v243_v49  ;;  %v3770_v54 = vand.u32 4294901760, %v3758_v48  ;;  %v3777_v57 = vand.u32 4294901760, %v148_v55  ;;  %v3790_v63 = vand.u32 4294901760, %v147_v61  ;;  %p3516_p13 = pnand %p3515_p12, %p3509_p9 }
  0x33   : > { %2888 = vmatprep.subr.mxu0 %v3668_v8  ;;  %2964 = vmatprep.subr.mxu1 %v572_v23  ;;  %v607_v58 = vand.u32 4294901760, %v606_v53  ;;  %v3783_v60 = vand.u32 4294901760, %v3774_v56  ;;  %v3787_v62 = vsub.f32 %v149_v47, %v3764_v50  ;;  %v3803_v16 = vand.u32 4294901760, %v146_v6 }
  0x34   : > { %5372 = vst [vmem:[#allocation17_spill] sm:$0xff] %v3770_v54  ;;  %2914 = vmatprep.mubr.f32.mxu0 %v244_v51  ;;  %v613_v59 = vsub.f32 %v3758_v48, %v3770_v54  ;;  %v3800_v7 = vsub.f32 %v148_v55, %v3777_v57  ;;  %v3813_v24 = vsub.f32 %v147_v61, %v3790_v63  ;;  %v143_v51 = vld [vmem:[%s3655_s27] sm:$0xff]  ;;  %v3841_v53 = vand.u32 4294901760, %v111_v39  ;;  %v113_v55 = vld [vmem:[#allocation2 + $0x18] sm:$0xff] }
  0x35   : > { %5373 = vst [vmem:[#allocation18_spill] sm:$0xff] %v3783_v60  ;;  %v620_v1 = vsub.f32 %v3774_v56, %v3783_v60  ;;  %v3796_v2 = vand.u32 4294901760, %v3787_v62  ;;  %v3825_v33 = vsub.f32 %v146_v6, %v3803_v16  ;;  %v118_v60 = vld [vmem:[#allocation2 + $0x40] sm:$0xff] }
  0x36   : > { %2889 = vmatpush3.xpose.msra.mxu0 %v3668_v8  ;;  %2965 = vmatpush3.xpose.msra.mxu1 %v572_v23  ;;  %v614_v0 = vand.u32 4294901760, %v613_v59  ;;  %v3809_v22 = vand.u32 4294901760, %v3800_v7  ;;  %v145_v23 = vld [vmem:[%s3655_s27 + $0x10] sm:$0xff]  ;;  %v3822_v31 = vand.u32 4294901760, %v3813_v24  ;;  %5379 = vst [vmem:[#allocation24_spill] sm:$0xff] %v3841_v53 }
  0x37   : > { %2890 = vmatprep.subr.mxu0 %v3681_v12  ;;  %2966 = vmatprep.subr.mxu1 %v579_v28  ;;  %5374 = vst [vmem:[#allocation19_spill] sm:$0xff] %v3796_v2  ;;  %v621_v18 = vand.u32 4294901760, %v620_v1  ;;  %v627_v19 = vsub.f32 %v3787_v62, %v3796_v2  ;;  %v3816_v26 = vand.u32 4294901760, %v145_v23  ;;  %v3838_v49 = vand.u32 4294901760, %v3825_v33 }
  0x38   : > { %5375 = vst [vmem:[#allocation20_spill] sm:$0xff] %v3809_v22  ;;  %v634_v29 = vsub.f32 %v3800_v7, %v3809_v22  ;;  %5376 = vst [vmem:[#allocation21_spill] sm:$0xff] %v3822_v31  ;;  %v641_v45 = vsub.f32 %v3813_v24, %v3822_v31  ;;  %v117_v22 = vld [vmem:[#allocation2 + $0x38] sm:$0xff] }
  0x39   : > { %v3830_v37 = vsub.f32 %v145_v23, %v3816_v26  ;;  %5378 = vst [vmem:[#allocation23_spill] sm:$0xff] %v3838_v49  ;;  %v3860_v23 = vsub.f32 %v111_v39, %v3841_v53  ;;  %v3903_v38 = vand.u32 4294901760, %v117_v22 }
  0x3a   : > { %2891 = vmatpush3.xpose.msra.mxu0 %v3681_v12  ;;  %2967 = vmatpush3.xpose.msra.mxu1 %v579_v28  ;;  %v628_v28 = vand.u32 4294901760, %v627_v19  ;;  %v642_v61 = vand.u32 4294901760, %v641_v45  ;;  %v114_v19 = vld [vmem:[#allocation2 + $0x20] sm:$0xff]  ;;  %v115_v45 = vld [vmem:[#allocation2 + $0x28] sm:$0xff] }
  0x3b   : > { %2892 = vmatprep.subr.mxu0 %v3702_v20  ;;  %2968 = vmatprep.subr.mxu1 %v586_v36  ;;  %v3847_v59 = vand.u32 4294901760, %v3830_v37  ;;  %5384 = vst [vmem:[#allocation29_spill] sm:$0xff] %v3860_v23  ;;  %v3875_v35 = vand.u32 4294901760, %v114_v19  ;;  %5394 = vst [vmem:[#allocation38_spill] sm:$0xff] %v3903_v38  ;;  %v3923_v13 = vsub.f32 %v117_v22, %v3903_v38 }
  0x3d   : > { %5381 = vst [vmem:[#allocation26_spill] sm:$0xff] %v3847_v59  ;;  %5387 = vst [vmem:[#allocation32_spill] sm:$0xff] %v3875_v35 }
  0x3e   : > { %2893 = vmatpush3.xpose.msra.mxu0 %v3702_v20  ;;  %2969 = vmatpush3.xpose.msra.mxu1 %v586_v36  ;;  %v144_v36 = vld [vmem:[%s3655_s27 + $0x8] sm:$0xff] }
  0x3f   : > { %2894 = vmatprep.subr.mxu0 %v3715_v27  ;;  %2970 = vmatprep.subr.mxu1 %v593_v44  ;;  %v3835_v47 = vand.u32 4294901760, %v144_v36 }
  0x41   : > { %5377 = vst [vmem:[#allocation22_spill] sm:$0xff] %v3835_v47  ;;  %v3853_v1 = vsub.f32 %v144_v36, %v3835_v47 }
  0x42   : > { %2895 = vmatpush3.xpose.msra.mxu0 %v3715_v27  ;;  %2971 = vmatpush3.xpose.msra.mxu1 %v593_v44  ;;  %v635_v44 = vand.u32 4294901760, %v634_v29 }
  0x43   : > { %2896 = vmatprep.subr.mxu0 %v3728_v34  ;;  %2972 = vmatprep.subr.mxu1 %v600_v52  ;;  %v3870_v43 = vand.u32 4294901760, %v3853_v1 }
  0x45   : > { %5385 = vst [vmem:[#allocation30_spill] sm:$0xff] %v3870_v43 }
  0x46   : > { %2897 = vmatpush3.xpose.msra.mxu0 %v3728_v34  ;;  %2973 = vmatpush3.xpose.msra.mxu1 %v600_v52  ;;  %v112_v52 = vld [vmem:[#allocation2 + $0x10] sm:$0xff] }
  0x47   : > { %2898 = vmatprep.subr.mxu0 %v3747_v42  ;;  %2974 = vmatprep.subr.mxu1 %v607_v58  ;;  %v3855_v6 = vand.u32 4294901760, %v112_v52 }
  0x49   : > { %5382 = vst [vmem:[#allocation27_spill] sm:$0xff] %v3855_v6  ;;  %v3873_v39 = vsub.f32 %v112_v52, %v3855_v6  ;;  %v662_v52 = vsub.f32 %v3853_v1, %v3870_v43  ;;  %v119_v43 = vld [vmem:[#allocation2 + $0x48] sm:$0xff] }
  0x4a   : > { %2899 = vmatpush3.xpose.msra.mxu0 %v3747_v42  ;;  %2975 = vmatpush3.xpose.msra.mxu1 %v607_v58  ;;  %v3844_v58 = vand.u32 4294901760, %v143_v51 }
  0x4b   : > { %2900 = vmatprep.subr.mxu0 %v3764_v50  ;;  %2976 = vmatprep.subr.mxu1 %v614_v0  ;;  %5386 = vst [vmem:[#allocation31_spill] sm:$0xff] %v3873_v39 }
  0x4c   : > { %5380 = vst [vmem:[#allocation25_spill] sm:$0xff] %v3844_v58  ;;  %v3866_v29 = vsub.f32 %v143_v51, %v3844_v58  ;;  %v3892_v51 = vsub.f32 %v114_v19, %v3875_v35 }
  0x4e   : > { %2901 = vmatpush3.xpose.msra.mxu0 %v3764_v50  ;;  %2977 = vmatpush3.xpose.msra.mxu1 %v614_v0  ;;  %v648_v0 = vsub.f32 %v3825_v33, %v3838_v49  ;;  %v3881_v49 = vand.u32 4294901760, %v115_v45  ;;  %v3885_v31 = vand.u32 4294901760, %v3866_v29 }
  0x4f   : > { %2902 = vmatprep.subr.mxu0 %v3777_v57  ;;  %2978 = vmatprep.subr.mxu1 %v621_v18 }
  0x50   : > { %v649_v36 = vand.u32 4294901760, %v648_v0  ;;  %5389 = vst [vmem:[#allocation34_spill] sm:$0xff] %v3881_v49  ;;  %5390 = vst [vmem:[#allocation35_spill] sm:$0xff] %v3885_v31  ;;  %v3901_v46 = vsub.f32 %v115_v45, %v3881_v49  ;;  %v669_v19 = vsub.f32 %v3866_v29, %v3885_v31 }
  0x52   : > { %2903 = vmatpush3.xpose.msra.mxu0 %v3777_v57  ;;  %2979 = vmatpush3.xpose.msra.mxu1 %v621_v18  ;;  %v3857_v18 = vand.u32 4294901760, %v113_v55  ;;  %5393 = vst [vmem:[#allocation37_spill] sm:$0xff] %v3901_v46 }
  0x53   : > { %2904 = vmatprep.subr.mxu0 %v3790_v63  ;;  %2980 = vmatprep.subr.mxu1 %v628_v28 }
  0x54   : > { %5383 = vst [vmem:[#allocation28_spill] sm:$0xff] %v3857_v18 }
  0x56   : > { %2905 = vmatpush3.xpose.msra.mxu0 %v3790_v63  ;;  %2981 = vmatpush3.xpose.msra.mxu1 %v628_v28  ;;  %v655_v28 = vsub.f32 %v3830_v37, %v3847_v59  ;;  %v116_v59 = vld [vmem:[#allocation2 + $0x30] sm:$0xff] }
  0x57   : > { %2906 = vmatprep.subr.mxu0 %v3803_v16  ;;  %2982 = vmatprep.subr.mxu1 %v635_v44  ;;  %v3894_v2 = vand.u32 4294901760, %v116_v59 }
  0x58   : > { %v656_v0 = vand.u32 4294901760, %v655_v28  ;;  %v5392_v28 = vand.u32 4294901760, %v3860_v23 }
  0x59   : > { %5391 = vst [vmem:[#allocation36_spill] sm:$0xff] %v3894_v2  ;;  %v3916_v25 = vsub.f32 %v116_v59, %v3894_v2 }
  0x5a   : > { %2907 = vmatpush3.xpose.msra.mxu0 %v3803_v16  ;;  %2983 = vmatpush3.xpose.msra.mxu1 %v635_v44  ;;  %v3878_v44 = vsub.f32 %v113_v55, %v3857_v18  ;;  %v253_v54 = vsub.f32 %v3860_v23, %v5392_v28  ;;  %v3908_v55 = vand.u32 4294901760, %v118_v60  ;;  %v5396_v28 = vand.u32 4294901760, %v3873_v39 }
  0x5b   : > { %2908 = vmatprep.subr.mxu0 %v3816_v26  ;;  %2984 = vmatprep.subr.mxu1 %v642_v61  ;;  %5397 = vst [vmem:[#allocation40_spill] sm:$0xff] %v3916_v25  ;;  %v5270_v22 = vand.u32 4294901760, %v3916_v25 }
  0x5c   : > { %5388 = vst [vmem:[#allocation33_spill] sm:$0xff] %v3878_v44  ;;  %5395 = vst [vmem:[#allocation39_spill] sm:$0xff] %v3908_v55  ;;  %v263_v45 = vsub.f32 %v3873_v39, %v5396_v28  ;;  %v254_v14 = vand.u32 4294901760, %v253_v54  ;;  %v670_v28 = vand.u32 4294901760, %v669_v19  ;;  %v3929_v59 = vsub.f32 %v118_v60, %v3908_v55 }
  0x5d   : > { %v5400_v54 = vand.u32 4294901760, %v3892_v51  ;;  %v3958_v19 = vand.u32 4294901760, %v123_v41 }
  0x5e   : > { %2909 = vmatpush3.xpose.msra.mxu0 %v3816_v26  ;;  %2985 = vmatpush3.xpose.msra.mxu1 %v642_v61  ;;  %v663_v61 = vand.u32 4294901760, %v662_v52  ;;  %v3925_v52 = vand.u32 4294901760, %v119_v43 }
  0x5f   : > { %2910 = vmatprep.subr.mxu0 %v3835_v47  ;;  %2986 = vmatprep.subr.mxu1 %v649_v36  ;;  %v283_v23 = vsub.f32 %v3892_v51, %v5400_v54  ;;  %5406 = vst [vmem:[#allocation46_spill] sm:$0xff] %v3958_v19 }
  0x60   : > { %5399 = vst [vmem:[#allocation41_spill] sm:$0xff] %v3925_v52 }
  0x62   : > { %2911 = vmatpush3.xpose.msra.mxu0 %v3835_v47  ;;  %2987 = vmatpush3.xpose.msra.mxu1 %v649_v36  ;;  %v5398_v36 = vand.u32 4294901760, %v3878_v44  ;;  %v3943_v47 = vsub.f32 %v119_v43, %v3925_v52 }
  0x63   : > { %2912 = vmatprep.subr.mxu0 %v3844_v58  ;;  %2988 = vmatprep.subr.mxu1 %v656_v0 }
  0x64   : > { %v273_v31 = vsub.f32 %v3878_v44, %v5398_v36  ;;  %v264_v36 = vand.u32 4294901760, %v263_v45  ;;  %v3936_v44 = vand.u32 4294901760, %v120_v15  ;;  %5403 = vst [vmem:[#allocation43_spill] sm:$0xff] %v3943_v47  ;;  %v3945_v45 = vand.u32 4294901760, %v121_v30 }
  0x66   : > { %2913 = vmatpush3.xpose.msra.mxu0 %v3844_v58  ;;  %2989 = vmatpush3.xpose.msra.mxu1 %v656_v0  ;;  %5401 = vst [vmem:[#allocation42_spill] sm:$0xff] %v3936_v44  ;;  %v274_v39 = vand.u32 4294901760, %v273_v31  ;;  %v122_v58 = vld [vmem:[#allocation2 + $0x60] sm:$0xff]  ;;  %v5402_v0 = vand.u32 4294901760, %v3901_v46  ;;  %5404 = vst [vmem:[#allocation44_spill] sm:$0xff] %v3945_v45  ;;  %v303_v31 = vsub.f32 %v3916_v25, %v5270_v22 }
  0x67   : > { %2990 = vmatprep.subr.mxu1 %v663_v61  ;;  %3042 = vmatprep.subr.mxu0 %v3672_v9  ;;  %v3955_v43 = vand.u32 4294901760, %v122_v58  ;;  %v3965_v22 = vsub.f32 %v121_v30, %v3945_v45  ;;  %v126_v30 = vld [vmem:[#allocation2 + $0x80] sm:$0xff] }
  0x68   : > { %v293_v60 = vsub.f32 %v3901_v46, %v5402_v0  ;;  %v3953_v0 = vsub.f32 %v120_v15, %v3936_v44  ;;  %v5409_v15 = vand.u32 4294901760, %v3929_v59  ;;  %v125_v46 = vld [vmem:[#allocation2 + $0x78] sm:$0xff] }
  0x69   : > { %2915 = vmatmul.mubr.f32.vlgmr.msra.gmra.mxu0 %v254_v14  ;;  %v284_v14 = vand.u32 4294901760, %v283_v23  ;;  %5405 = vst [vmem:[#allocation45_spill] sm:$0xff] %v3955_v43  ;;  %5408 = vst [vmem:[#allocation47_spill] sm:$0xff] %v3965_v22 }
  0x6a   : > { %2991 = vmatpush3.xpose.msra.mxu1 %v663_v61  ;;  %3043 = vmatpush3.xpose.msra.mxu0 %v3672_v9  ;;  %v124_v61 = vld [vmem:[#allocation2 + $0x70] sm:$0xff]  ;;  %v294_v9 = vand.u32 4294901760, %v293_v60  ;;  %v323_v25 = vsub.f32 %v3929_v59, %v5409_v15  ;;  %v3991_v60 = vand.u32 4294901760, %v126_v30 }
  0x6b   : > { %2917 = vmatprep.mubr.f32.mxu0 %v264_v36  ;;  %2992 = vmatprep.subr.mxu1 %v670_v28  ;;  %v5407_v36 = vand.u32 4294901760, %v3923_v13  ;;  %v3976_v54 = vand.u32 4294901760, %v124_v61 }
  0x6c   : > { %3044 = vmatprep.subr.mxu0 %v3675_v10 }
  0x6d   : > { %2918 = vmatmul.mubr.f32.gmra.mxu0 %v274_v39  ;;  %v313_v23 = vsub.f32 %v3923_v13, %v5407_v36  ;;  %v304_v39 = vand.u32 4294901760, %v303_v31  ;;  %v3974_v36 = vsub.f32 %v122_v58, %v3955_v43  ;;  %5411 = vst [vmem:[#allocation49_spill] sm:$0xff] %v3976_v54  ;;  %v3987_v58 = vand.u32 4294901760, %v125_v46 }
  0x6e   : > { %2993 = vmatpush3.xpose.msra.mxu1 %v670_v28  ;;  %3045 = vmatpush3.xpose.msra.mxu0 %v3675_v10  ;;  %v3980_v10 = vsub.f32 %v123_v41, %v3958_v19  ;;  %v127_v41 = vld [vmem:[#allocation2 + $0x88] sm:$0xff]  ;;  %v3999_v15 = vsub.f32 %v124_v61, %v3976_v54 }
  0x6f   : > { %2920 = vmatprep.mubr.f32.mxu0 %v284_v14  ;;  %3046 = vmatprep.subr.mxu0 %v3678_v11  ;;  %5410 = vst [vmem:[#allocation48_spill] sm:$0xff] %v3974_v36  ;;  %v314_v28 = vand.u32 4294901760, %v313_v23  ;;  %v5412_v14 = vand.u32 4294901760, %v3943_v47  ;;  %v5413_v23 = vand.u32 4294901760, %v3953_v0  ;;  %v4011_v61 = vand.u32 4294901760, %v127_v41 }
  0x70   : > { %3122 = vmatprep.subr.mxu1 %v3660_v3 }
  0x71   : > { %2921 = vmatmul.mubr.f32.gmra.mxu0 %v294_v9  ;;  %2995 = vmatmul.mubr.f32.vlgmr.msra.gmra.mxu1 %v3841_v53  ;;  %v333_v31 = vsub.f32 %v3943_v47, %v5412_v14  ;;  %v324_v9 = vand.u32 4294901760, %v323_v25  ;;  %v343_v53 = vsub.f32 %v3953_v0, %v5413_v23  ;;  %v128_v47 = vld [vmem:[#allocation2 + $0x90] sm:$0xff]  ;;  %v4009_v14 = vsub.f32 %v125_v46, %v3987_v58 }
  0x72   : > { %3047 = vmatpush3.xpose.msra.mxu0 %v3678_v11  ;;  %3123 = vmatpush3.xpose.msra.mxu1 %v3660_v3  ;;  %5416 = vst [vmem:[#allocation51_spill] sm:$0xff] %v4011_v61  ;;  %v4016_v11 = vsub.f32 %v126_v30, %v3991_v60 }
  0x73   : > { %2923 = vmatprep.mubr.f32.mxu0 %v304_v39  ;;  %2997 = vmatprep.mubr.f32.mxu1 %v3855_v6  ;;  %v334_v25 = vand.u32 4294901760, %v333_v31  ;;  %v5414_v39 = vand.u32 4294901760, %v3965_v22  ;;  %5415 = vst [vmem:[#allocation50_spill] sm:$0xff] %v4009_v14  ;;  %v344_v31 = vand.u32 4294901760, %v343_v53  ;;  %v4023_v6 = vand.u32 4294901760, %v128_v47 }
  0x74   : > { %3048 = vmatprep.subr.mxu0 %v3695_v17  ;;  %3124 = vmatprep.subr.mxu1 %v3662_v4  ;;  %5417 = vst [vmem:[#allocation52_spill] sm:$0xff] %v4016_v11 }
  0x75   : > { %2924 = vmatmul.mubr.f32.gmra.mxu0 %v314_v28  ;;  %2998 = vmatmul.mubr.f32.gmra.mxu1 %v3857_v18  ;;  %v353_v23 = vsub.f32 %v3965_v22, %v5414_v39  ;;  %v129_v28 = vld [vmem:[#allocation2 + $0x98] sm:$0xff]  ;;  %v5418_v18 = vand.u32 4294901760, %v3974_v36  ;;  %v131_v22 = vld [vmem:[#allocation2 + $0xa8] sm:$0xff] }
  0x76   : > { %3049 = vmatpush3.xpose.msra.mxu0 %v3695_v17  ;;  %3125 = vmatpush3.xpose.msra.mxu1 %v3662_v4  ;;  %v5419_v17 = vand.u32 4294901760, %v3980_v10  ;;  %v4035_v46 = vand.u32 4294901760, %v129_v28 }
  0x77   : > { %2926 = vmatprep.mubr.f32.mxu0 %v324_v9  ;;  %3000 = vmatprep.mubr.f32.mxu1 %v3875_v35  ;;  %v363_v39 = vsub.f32 %v3974_v36, %v5418_v18  ;;  %v130_v9 = vld [vmem:[#allocation2 + $0xa0] sm:$0xff]  ;;  %v354_v53 = vand.u32 4294901760, %v353_v23  ;;  %v4033_v18 = vsub.f32 %v127_v41, %v4011_v61  ;;  %v5420_v23 = vand.u32 4294901760, %v3999_v15  ;;  %v132_v36 = vld [vmem:[#allocation2 + $0xb0] sm:$0xff] }
  0x78   : > { %3050 = vmatprep.subr.mxu0 %v3705_v21  ;;  %3126 = vmatprep.subr.mxu1 %v3664_v5  ;;  %v373_v30 = vsub.f32 %v3980_v10, %v5419_v17  ;;  %v4045_v41 = vsub.f32 %v128_v47, %v4023_v6  ;;  %v4047_v35 = vand.u32 4294901760, %v130_v9  ;;  %v4057_v47 = vsub.f32 %v129_v28, %v4035_v46 }
  0x79   : > { %2927 = vmatmul.mubr.f32.gmra.mxu0 %v334_v25  ;;  %3001 = vmatmul.mubr.f32.gmra.mxu1 %v3881_v49  ;;  %v364_v25 = vand.u32 4294901760, %v363_v39  ;;  %v383_v17 = vsub.f32 %v3999_v15, %v5420_v23  ;;  %v133_v49 = vld [vmem:[#allocation2 + $0xb8] sm:$0xff] }
  0x7a   : > { %3051 = vmatpush3.xpose.msra.mxu0 %v3705_v21  ;;  %3127 = vmatpush3.xpose.msra.mxu1 %v3664_v5  ;;  %v374_v21 = vand.u32 4294901760, %v373_v30  ;;  %v5422_v30 = vand.u32 4294901760, %v4016_v11  ;;  %v4069_v28 = vsub.f32 %v130_v9, %v4047_v35 }
  0x7b   : > { %2929 = vmatprep.mubr.f32.mxu0 %v344_v31  ;;  %3003 = vmatprep.mubr.f32.mxu1 %v3894_v2  ;;  %v5421_v31 = vand.u32 4294901760, %v4009_v14  ;;  %v4059_v2 = vand.u32 4294901760, %v131_v22 }
  0x7c   : > { %3052 = vmatprep.subr.mxu0 %v3725_v32  ;;  %3128 = vmatprep.subr.mxu1 %v3668_v8  ;;  %5423 = vst [vmem:[#allocation53_spill] sm:$0xff] %v4069_v28 }
  0x7d   : > { %2930 = vmatmul.mubr.f32.gmra.mxu0 %v354_v53  ;;  %3004 = vmatmul.mubr.f32.gmra.mxu1 %v3903_v38  ;;  %v393_v39 = vsub.f32 %v4009_v14, %v5421_v31  ;;  %v403_v53 = vsub.f32 %v4016_v11, %v5422_v30  ;;  %v384_v31 = vand.u32 4294901760, %v383_v17  ;;  %v4071_v38 = vand.u32 4294901760, %v132_v36  ;;  %v134_v14 = vld [vmem:[#allocation2 + $0xc0] sm:$0xff]  ;;  %v135_v11 = vld [vmem:[#allocation2 + $0xc8] sm:$0xff] }
  0x7e   : > { %3053 = vmatpush3.xpose.msra.mxu0 %v3725_v32  ;;  %3129 = vmatpush3.xpose.msra.mxu1 %v3668_v8  ;;  %v4075_v32 = vand.u32 4294901760, %v133_v49  ;;  %v5424_v17 = vand.u32 4294901760, %v4033_v18  ;;  %v4083_v23 = vsub.f32 %v131_v22, %v4059_v2 }
  0x7f   : > { %2932 = vmatprep.mubr.f32.mxu0 %v364_v25  ;;  %3006 = vmatprep.mubr.f32.mxu1 %v3908_v55  ;;  %v394_v25 = vand.u32 4294901760, %v393_v39  ;;  %v4087_v55 = vand.u32 4294901760, %v134_v14  ;;  %v5425_v39 = vand.u32 4294901760, %v4045_v41  ;;  %v4095_v22 = vsub.f32 %v132_v36, %v4071_v38 }
  0x80   : > { %3054 = vmatprep.subr.mxu0 %v3740_v40  ;;  %3130 = vmatprep.subr.mxu1 %v3681_v12  ;;  %v413_v30 = vsub.f32 %v4033_v18, %v5424_v17  ;;  %v4107_v36 = vand.u32 4294901760, %v135_v11 }
  0x81   : > { %2933 = vmatmul.mubr.f32.gmra.mxu0 %v374_v21  ;;  %3007 = vmatmul.mubr.f32.gmra.mxu1 %v3925_v52  ;;  %v404_v21 = vand.u32 4294901760, %v403_v53  ;;  %v423_v17 = vsub.f32 %v4045_v41, %v5425_v39  ;;  %5426 = vst [vmem:[#allocation54_spill] sm:$0xff] %v4095_v22  ;;  %v137_v52 = vld [vmem:[#allocation2 + $0xd8] sm:$0xff] }
  0x82   : > { %3055 = vmatpush3.xpose.msra.mxu0 %v3740_v40  ;;  %3131 = vmatpush3.xpose.msra.mxu1 %v3681_v12  ;;  %v4100_v40 = vsub.f32 %v133_v49, %v4075_v32  ;;  %v414_v53 = vand.u32 4294901760, %v413_v30  ;;  %v4112_v49 = vsub.f32 %v134_v14, %v4087_v55  ;;  %v5429_v30 = vand.u32 4294901760, %v4069_v28  ;;  %v138_v14 = vld [vmem:[#allocation2 + $0xe0] sm:$0xff] }
  0x83   : > { %2935 = vmatprep.mubr.f32.mxu0 %v384_v31  ;;  %3009 = vmatprep.mubr.f32.mxu1 %v3936_v44  ;;  %v136_v31 = vld [vmem:[#allocation2 + $0xd0] sm:$0xff]  ;;  %v5428_v44 = vand.u32 4294901760, %v4057_v47  ;;  %v4131_v9 = vand.u32 4294901760, %v137_v52 }
  0x84   : > { %3056 = vmatprep.subr.mxu0 %v3758_v48  ;;  %3132 = vmatprep.subr.mxu1 %v3702_v20  ;;  %5427 = vst [vmem:[#allocation55_spill] sm:$0xff] %v4100_v40 }
  0x85   : > { %2936 = vmatmul.mubr.f32.gmra.mxu0 %v394_v25  ;;  %3010 = vmatmul.mubr.f32.gmra.mxu1 %v3945_v45  ;;  %v433_v39 = vsub.f32 %v4057_v47, %v5428_v44  ;;  %v424_v25 = vand.u32 4294901760, %v423_v17  ;;  %v443_v44 = vsub.f32 %v4069_v28, %v5429_v30  ;;  %v4119_v45 = vand.u32 4294901760, %v136_v31  ;;  %v139_v28 = vld [vmem:[#allocation2 + $0xe8] sm:$0xff] }
  0x86   : > { %3057 = vmatpush3.xpose.msra.mxu0 %v3758_v48  ;;  %3133 = vmatpush3.xpose.msra.mxu1 %v3702_v20  ;;  %v5430_v17 = vand.u32 4294901760, %v4083_v23  ;;  %v4129_v30 = vsub.f32 %v135_v11, %v4107_v36  ;;  %v140_v48 = vld [vmem:[#allocation2 + $0xf0] sm:$0xff] }
  0x87   : > { %2938 = vmatprep.mubr.f32.mxu0 %v404_v21  ;;  %3012 = vmatprep.mubr.f32.mxu1 %v3955_v43  ;;  %v434_v21 = vand.u32 4294901760, %v433_v39  ;;  %v5431_v39 = vand.u32 4294901760, %v4095_v22  ;;  %v4141_v11 = vsub.f32 %v136_v31, %v4119_v45  ;;  %v4153_v31 = vsub.f32 %v137_v52, %v4131_v9 }
  0x88   : > { %3058 = vmatprep.subr.mxu0 %v3774_v56  ;;  %3134 = vmatprep.subr.mxu1 %v3715_v27  ;;  %v453_v43 = vsub.f32 %v4083_v23, %v5430_v17 }
  0x89   : > { %2939 = vmatmul.mubr.f32.gmra.mxu0 %v414_v53  ;;  %3013 = vmatmul.mubr.f32.gmra.mxu1 %v3958_v19  ;;  %v444_v53 = vand.u32 4294901760, %v443_v44  ;;  %v463_v17 = vsub.f32 %v4095_v22, %v5431_v39  ;;  %v4143_v19 = vand.u32 4294901760, %v138_v14  ;;  %v5433_v22 = vand.u32 4294901760, %v4112_v49 }
  0x8a   : > { %3059 = vmatpush3.xpose.msra.mxu0 %v3774_v56  ;;  %3135 = vmatpush3.xpose.msra.mxu1 %v3715_v27  ;;  %v5432_v56 = vand.u32 4294901760, %v4100_v40  ;;  %v454_v44 = vand.u32 4294901760, %v453_v43  ;;  %v4167_v39 = vand.u32 4294901760, %v140_v48 }
  0x8b   : > { %2941 = vmatprep.mubr.f32.mxu0 %v424_v25  ;;  %3015 = vmatprep.mubr.f32.mxu1 %v3976_v54  ;;  %v4155_v54 = vand.u32 4294901760, %v139_v28  ;;  %v464_v43 = vand.u32 4294901760, %v463_v17  ;;  %v4165_v52 = vsub.f32 %v138_v14, %v4143_v19 }
  0x8c   : > { %3060 = vmatprep.subr.mxu0 %v3787_v62  ;;  %3136 = vmatprep.subr.mxu1 %v3728_v34  ;;  %v473_v25 = vsub.f32 %v4100_v40, %v5432_v56  ;;  %v483_v56 = vsub.f32 %v4112_v49, %v5433_v22  ;;  %v141_v40 = vld [vmem:[#allocation2 + $0xf8] sm:$0xff]  ;;  %v5434_v22 = vand.u32 4294901760, %v4129_v30  ;;  %v4189_v17 = vsub.f32 %v140_v48, %v4167_v39 }
  0x8d   : > { %2942 = vmatmul.mubr.f32.gmra.mxu0 %v434_v21  ;;  %3016 = vmatmul.mubr.f32.gmra.mxu1 %v3987_v58  ;;  %v4177_v21 = vsub.f32 %v139_v28, %v4155_v54  ;;  %v4179_v14 = vand.u32 4294901760, %v141_v40  ;;  %v5436_v28 = vand.u32 4294901760, %v4153_v31 }
  0x8e   : > { %3061 = vmatpush3.xpose.msra.mxu0 %v3787_v62  ;;  %3137 = vmatpush3.xpose.msra.mxu1 %v3728_v34  ;;  %v474_v62 = vand.u32 4294901760, %v473_v25  ;;  %v484_v25 = vand.u32 4294901760, %v483_v56 }
  0x8f   : > { %2944 = vmatprep.mubr.f32.mxu0 %v444_v53  ;;  %3018 = vmatprep.mubr.f32.mxu1 %v3991_v60  ;;  %v493_v53 = vsub.f32 %v4129_v30, %v5434_v22  ;;  %v522_v22 = vand.u32 4294901760, %v4165_v52  ;;  %v513_v56 = vsub.f32 %v4153_v31, %v5436_v28 }
  0x90   : > { %3062 = vmatprep.subr.mxu0 %v3800_v7  ;;  %3138 = vmatprep.subr.mxu1 %v3747_v42 }
  0x91   : > { %2945 = vmatmul.mubr.f32.gmra.mxu0 %v454_v44  ;;  %3019 = vmatmul.mubr.f32.gmra.mxu1 %v4011_v61  ;;  %v5435_v44 = vand.u32 4294901760, %v4141_v11 }
  0x92   : > { %3063 = vmatpush3.xpose.msra.mxu0 %v3800_v7  ;;  %3139 = vmatpush3.xpose.msra.mxu1 %v3747_v42  ;;  %v494_v7 = vand.u32 4294901760, %v493_v53  ;;  %v542_v53 = vand.u32 4294901760, %v4189_v17 }
  0x93   : > { %2947 = vmatprep.mubr.f32.mxu0 %v464_v43  ;;  %3021 = vmatprep.mubr.f32.mxu1 %v4023_v6  ;;  %v503_v61 = vsub.f32 %v4141_v11, %v5435_v44  ;;  %v532_v43 = vand.u32 4294901760, %v4177_v21  ;;  %v4199_v44 = vsub.f32 %v141_v40, %v4179_v14 }
  0x94   : > { %3064 = vmatprep.subr.mxu0 %v3813_v24  ;;  %3140 = vmatprep.subr.mxu1 %v3764_v50 }
  0x95   : > { %2948 = vmatmul.mubr.f32.gmra.mxu0 %v474_v62  ;;  %3022 = vmatmul.mubr.f32.gmra.mxu1 %v4035_v46  ;;  %v504_v48 = vand.u32 4294901760, %v503_v61  ;;  %v523_v62 = vsub.f32 %v4165_v52, %v522_v22  ;;  %v533_v40 = vsub.f32 %v4177_v21, %v532_v43  ;;  %v552_v61 = vand.u32 4294901760, %v4199_v44 }
  0x96   : > { %3065 = vmatpush3.xpose.msra.mxu0 %v3813_v24  ;;  %3141 = vmatpush3.xpose.msra.mxu1 %v3764_v50  ;;  %v514_v24 = vand.u32 4294901760, %v513_v56 }
  0x97   : > { %2950 = vmatprep.mubr.f32.mxu0 %v484_v25  ;;  %3024 = vmatprep.mubr.f32.mxu1 %v4047_v35  ;;  %v524_v25 = vand.u32 4294901760, %v523_v62  ;;  %v534_v28 = vand.u32 4294901760, %v533_v40  ;;  %v5439_v62 = vld [vmem:[#allocation8_spill] sm:$0xff]  ;;  %v5442_v40 = vld [vmem:[#allocation25_spill] sm:$0xff] }
  0x98   : > { %3066 = vmatprep.subr.mxu0 %v3825_v33  ;;  %3142 = vmatprep.subr.mxu1 %v3777_v57 }
  0x99   : > { %2951 = vmatmul.mubr.f32.gmra.mxu0 %v494_v7  ;;  %3025 = vmatmul.mubr.f32.gmra.mxu1 %v4059_v2  ;;  %v543_v7 = vsub.f32 %v4189_v17, %v542_v53 }
  0x9a   : > { %3067 = vmatpush3.xpose.msra.mxu0 %v3825_v33  ;;  %3143 = vmatpush3.xpose.msra.mxu1 %v3777_v57  ;;  %v553_v33 = vsub.f32 %v4199_v44, %v552_v61 }
  0x9b   : > { %2953 = vmatprep.mubr.f32.mxu0 %v504_v48  ;;  %3027 = vmatprep.mubr.f32.mxu1 %v4071_v38  ;;  %v544_v56 = vand.u32 4294901760, %v543_v7  ;;  %v5444_v7 = vld [vmem:[#allocation33_spill] sm:$0xff] }
  0x9c   : > { %3068 = vmatprep.subr.mxu0 %v3830_v37  ;;  %3144 = vmatprep.subr.mxu1 %v3790_v63  ;;  %v554_v48 = vand.u32 4294901760, %v553_v33  ;;  %v5446_v33 = vld [vmem:[#allocation10_spill] sm:$0xff] }
  0x9d   : > { %2954 = vmatmul.mubr.f32.gmra.mxu0 %v514_v24  ;;  %3028 = vmatmul.mubr.f32.gmra.mxu1 %v4075_v32  ;;  %v5440_v24 = vld [vmem:[#allocation29_spill] sm:$0xff] }
  0x9e   : > { %3069 = vmatpush3.xpose.msra.mxu0 %v3830_v37  ;;  %3145 = vmatpush3.xpose.msra.mxu1 %v3790_v63  ;;  %v5437_v37 = vld [vmem:[#allocation15_spill] sm:$0xff] }
  0x9f   : > { %2956 = vmatprep.mubr.f32.mxu0 %v524_v25  ;;  %3030 = vmatprep.mubr.f32.mxu1 %v4087_v55  ;;  %v5443_v25 = vld [vmem:[#allocation9_spill] sm:$0xff] }
  0xa0   : > { %3070 = vmatprep.subr.mxu0 %v3853_v1  ;;  %3146 = vmatprep.subr.mxu1 %v3803_v16 }
  0xa1   : > { %2957 = vmatmul.mubr.f32.gmra.mxu0 %v534_v28  ;;  %3031 = vmatmul.mubr.f32.gmra.mxu1 %v4107_v36  ;;  %v5445_v28 = vand.u32 4294901760, %v5437_v37 }
  0xa2   : > { %3071 = vmatpush3.xpose.msra.mxu0 %v3853_v1  ;;  %3147 = vmatpush3.xpose.msra.mxu1 %v3803_v16  ;;  %v5438_v1 = vld [vmem:[#allocation22_spill] sm:$0xff] }
  0xa3   : > { %2959 = vmatprep.mubr.f32.mxu0 %v544_v56  ;;  %3033 = vmatprep.mubr.f32.mxu1 %v4119_v45  ;;  %v5447_v56 = vld [vmem:[#allocation37_spill] sm:$0xff] }
  0xa4   : > { %3072 = vmatprep.subr.mxu0 %v3866_v29  ;;  %3148 = vmatprep.subr.mxu1 %v3816_v26 }
  0xa5   : > { %2960 = vmatmul.mubr.f32.gmra.mxu0 %v554_v48  ;;  %3034 = vmatmul.mubr.f32.gmra.mxu1 %v4131_v9  ;;  %v5448_v48 = vand.u32 4294901760, %v5440_v24 }
  0xa6   : > { %3073 = vmatpush3.xpose.msra.mxu0 %v3866_v29  ;;  %3149 = vmatpush3.xpose.msra.mxu1 %v3816_v26  ;;  %v5441_v29 = vld [vmem:[#allocation31_spill] sm:$0xff] }
  0xa7   : > { %3036 = vmatprep.mubr.f32.mxu1 %v4143_v19  ;;  %3074 = vmatprep.mubr.f32.mxu0 %v5437_v37  ;;  %v5451_v37 = vld [vmem:[#allocation11_spill] sm:$0xff] }
  0xa8   : > { %3150 = vmatprep.subr.mxu1 %v5438_v1  ;;  %3202 = vmatprep.subr.mxu0 %v5439_v62 }
  0xa9   : > { %3037 = vmatmul.mubr.f32.gmra.mxu1 %v4155_v54  ;;  %3075 = vmatmul.mubr.f32.vlgmr.msra.gmra.mxu0 %v5440_v24  ;;  %v5454_v24 = vld [vmem:[#allocation12_spill] sm:$0xff] }
  0xaa   : > { %3151 = vmatpush3.xpose.msra.mxu1 %v5438_v1  ;;  %3203 = vmatpush3.xpose.msra.mxu0 %v5439_v62  ;;  %v5449_v62 = vld [vmem:[#allocation40_spill] sm:$0xff] }
  0xab   : > { %3039 = vmatprep.mubr.f32.mxu1 %v4167_v39  ;;  %3077 = vmatprep.mubr.f32.mxu0 %v5441_v29 }
  0xac   : > { %3152 = vmatprep.subr.mxu1 %v5442_v40  ;;  %3204 = vmatprep.subr.mxu0 %v5443_v25 }
  0xad   : > { %3040 = vmatmul.mubr.f32.gmra.mxu1 %v4179_v14  ;;  %3078 = vmatmul.mubr.f32.gmra.mxu0 %v5444_v7 }
  0xae   : > { %3153 = vmatpush3.xpose.msra.mxu1 %v5442_v40  ;;  %3205 = vmatpush3.xpose.msra.mxu0 %v5443_v25  ;;  %v5450_v25 = vand.u32 4294901760, %v5441_v29  ;;  %v5455_v29 = vld [vmem:[#allocation43_spill] sm:$0xff] }
  0xaf   : > { %3080 = vmatprep.mubr.f32.mxu0 %v3892_v51  ;;  %3154 = vmatprep.mubr.f32.mxu1 %v5445_v28  ;;  %v5452_v28 = vand.u32 4294901760, %v5444_v7  ;;  %v5459_v7 = vld [vmem:[#allocation47_spill] sm:$0xff] }
  0xb0   : > { %3206 = vmatprep.subr.mxu0 %v5446_v33  ;;  %3282 = vmatprep.subr.mxu1 %v3660_v3 }
  0xb1   : > { %3081 = vmatmul.mubr.f32.gmra.mxu0 %v5447_v56  ;;  %3155 = vmatmul.mubr.f32.vlgmr.msra.gmra.mxu1 %v5448_v48  ;;  %v5460_v48 = vand.u32 4294901760, %v3923_v13 }
  0xb2   : > { %3207 = vmatpush3.xpose.msra.mxu0 %v5446_v33  ;;  %3283 = vmatpush3.xpose.msra.mxu1 %v3660_v3  ;;  %v5453_v3 = vand.u32 4294901760, %v3892_v51  ;;  %v5456_v33 = vand.u32 4294901760, %v5447_v56  ;;  %v5458_v51 = vld [vmem:[#allocation14_spill] sm:$0xff]  ;;  %v5461_v56 = vld [vmem:[#allocation48_spill] sm:$0xff] }
  0xb3   : > { %3083 = vmatprep.mubr.f32.mxu0 %v5449_v62  ;;  %3157 = vmatprep.mubr.f32.mxu1 %v5450_v25  ;;  %v5464_v25 = vand.u32 4294901760, %v5455_v29 }
  0xb4   : > { %3208 = vmatprep.subr.mxu0 %v5451_v37  ;;  %3284 = vmatprep.subr.mxu1 %v3662_v4 }
  0xb5   : > { %3084 = vmatmul.mubr.f32.gmra.mxu0 %v3923_v13  ;;  %3158 = vmatmul.mubr.f32.gmra.mxu1 %v5452_v28  ;;  %v5466_v13 = vld [vmem:[#allocation17_spill] sm:$0xff]  ;;  %v5469_v28 = vld [vmem:[#allocation52_spill] sm:$0xff] }
  0xb6   : > { %3209 = vmatpush3.xpose.msra.mxu0 %v5451_v37  ;;  %3285 = vmatpush3.xpose.msra.mxu1 %v3662_v4  ;;  %v5457_v4 = vand.u32 4294901760, %v5449_v62  ;;  %v5463_v62 = vld [vmem:[#allocation16_spill] sm:$0xff]  ;;  %v5468_v37 = vand.u32 4294901760, %v5459_v7 }
  0xb7   : > { %3086 = vmatprep.mubr.f32.mxu0 %v3929_v59  ;;  %3160 = vmatprep.mubr.f32.mxu1 %v5453_v3  ;;  %v5472_v3 = vand.u32 4294901760, %v3980_v10 }
  0xb8   : > { %3210 = vmatprep.subr.mxu0 %v5454_v24  ;;  %3286 = vmatprep.subr.mxu1 %v3664_v5 }
  0xb9   : > { %3087 = vmatmul.mubr.f32.gmra.mxu0 %v5455_v29  ;;  %3161 = vmatmul.mubr.f32.gmra.mxu1 %v5456_v33  ;;  %v5479_v33 = vand.u32 4294901760, %v4033_v18 }
  0xba   : > { %3211 = vmatpush3.xpose.msra.mxu0 %v5454_v24  ;;  %3287 = vmatpush3.xpose.msra.mxu1 %v3664_v5  ;;  %v5462_v5 = vand.u32 4294901760, %v3929_v59  ;;  %v5467_v59 = vld [vmem:[#allocation50_spill] sm:$0xff]  ;;  %v5474_v24 = vld [vmem:[#allocation19_spill] sm:$0xff] }
  0xbb   : > { %3089 = vmatprep.mubr.f32.mxu0 %v3953_v0  ;;  %3163 = vmatprep.mubr.f32.mxu1 %v5457_v4  ;;  %v5475_v29 = vand.u32 4294901760, %v5467_v59  ;;  %v5480_v4 = vld [vmem:[#allocation54_spill] sm:$0xff] }
  0xbc   : > { %3212 = vmatprep.subr.mxu0 %v5458_v51  ;;  %3288 = vmatprep.subr.mxu1 %v3668_v8 }
  0xbd   : > { %3090 = vmatmul.mubr.f32.gmra.mxu0 %v5459_v7  ;;  %3164 = vmatmul.mubr.f32.gmra.mxu1 %v5460_v48  ;;  %v5483_v7 = vld [vmem:[#allocation55_spill] sm:$0xff]  ;;  %v5484_v48 = vand.u32 4294901760, %v4057_v47 }
  0xbe   : > { %3213 = vmatpush3.xpose.msra.mxu0 %v5458_v51  ;;  %3289 = vmatpush3.xpose.msra.mxu1 %v3668_v8  ;;  %v5465_v8 = vand.u32 4294901760, %v3953_v0  ;;  %v5471_v0 = vld [vmem:[#allocation18_spill] sm:$0xff]  ;;  %v5482_v51 = vld [vmem:[#allocation21_spill] sm:$0xff] }
  0xbf   : > { %3092 = vmatprep.mubr.f32.mxu0 %v5461_v56  ;;  %3166 = vmatprep.mubr.f32.mxu1 %v5462_v5  ;;  %v5493_v5 = vand.u32 4294901760, %v4129_v30 }
  0xc0   : > { %3214 = vmatprep.subr.mxu0 %v5463_v62  ;;  %3290 = vmatprep.subr.mxu1 %v3681_v12 }
  0xc1   : > { %3093 = vmatmul.mubr.f32.gmra.mxu0 %v3980_v10  ;;  %3167 = vmatmul.mubr.f32.gmra.mxu1 %v5464_v25  ;;  %v5476_v10 = vld [vmem:[#allocation53_spill] sm:$0xff]  ;;  %v5512_v25 = vld [vmem:[#allocation51_spill] sm:$0xff] }
  0xc2   : > { %3215 = vmatpush3.xpose.msra.mxu0 %v5463_v62  ;;  %3291 = vmatpush3.xpose.msra.mxu1 %v3681_v12  ;;  %v5470_v12 = vand.u32 4294901760, %v5461_v56  ;;  %v5490_v56 = vand.u32 4294901760, %v5483_v7  ;;  %v5496_v62 = vand.u32 4294901760, %v4153_v31 }
  0xc3   : > { %3095 = vmatprep.mubr.f32.mxu0 %v3999_v15  ;;  %3169 = vmatprep.mubr.f32.mxu1 %v5465_v8 }
  0xc4   : > { %3216 = vmatprep.subr.mxu0 %v5466_v13  ;;  %3292 = vmatprep.subr.mxu1 %v3702_v20 }
  0xc5   : > { %3096 = vmatmul.mubr.f32.gmra.mxu0 %v5467_v59  ;;  %3170 = vmatmul.mubr.f32.gmra.mxu1 %v5468_v37 }
  0xc6   : > { %3217 = vmatpush3.xpose.msra.mxu0 %v5466_v13  ;;  %3293 = vmatpush3.xpose.msra.mxu1 %v3702_v20  ;;  %v5473_v20 = vand.u32 4294901760, %v3999_v15  ;;  %v5478_v15 = vld [vmem:[#allocation20_spill] sm:$0xff] }
  0xc7   : > { %3098 = vmatprep.mubr.f32.mxu0 %v5469_v28  ;;  %3172 = vmatprep.mubr.f32.mxu1 %v5470_v12 }
  0xc8   : > { %3218 = vmatprep.subr.mxu0 %v5471_v0  ;;  %3294 = vmatprep.subr.mxu1 %v3715_v27 }
  0xc9   : > { %3099 = vmatmul.mubr.f32.gmra.mxu0 %v4033_v18  ;;  %3173 = vmatmul.mubr.f32.gmra.mxu1 %v5472_v3  ;;  %v5486_v18 = vld [vmem:[#allocation23_spill] sm:$0xff] }
  0xca   : > { %3219 = vmatpush3.xpose.msra.mxu0 %v5471_v0  ;;  %3295 = vmatpush3.xpose.msra.mxu1 %v3715_v27  ;;  %v5477_v27 = vand.u32 4294901760, %v5469_v28 }
  0xcb   : > { %3101 = vmatprep.mubr.f32.mxu0 %v4045_v41  ;;  %3175 = vmatprep.mubr.f32.mxu1 %v5473_v20 }
  0xcc   : > { %3220 = vmatprep.subr.mxu0 %v5474_v24  ;;  %3296 = vmatprep.subr.mxu1 %v3728_v34 }
  0xcd   : > { %3102 = vmatmul.mubr.f32.gmra.mxu0 %v4057_v47  ;;  %3176 = vmatmul.mubr.f32.gmra.mxu1 %v5475_v29  ;;  %v5489_v47 = vld [vmem:[#allocation26_spill] sm:$0xff] }
  0xce   : > { %3221 = vmatpush3.xpose.msra.mxu0 %v5474_v24  ;;  %3297 = vmatpush3.xpose.msra.mxu1 %v3728_v34  ;;  %v5481_v34 = vand.u32 4294901760, %v4045_v41  ;;  %v5487_v41 = vand.u32 4294901760, %v4083_v23 }
  0xcf   : > { %3104 = vmatprep.mubr.f32.mxu0 %v5476_v10  ;;  %3178 = vmatprep.mubr.f32.mxu1 %v5477_v27 }
  0xd0   : > { %3222 = vmatprep.subr.mxu0 %v5478_v15  ;;  %3298 = vmatprep.subr.mxu1 %v3747_v42 }
  0xd1   : > { %3105 = vmatmul.mubr.f32.gmra.mxu0 %v4083_v23  ;;  %3179 = vmatmul.mubr.f32.gmra.mxu1 %v5479_v33  ;;  %v5492_v23 = vld [vmem:[#allocation30_spill] sm:$0xff] }
  0xd2   : > { %3223 = vmatpush3.xpose.msra.mxu0 %v5478_v15  ;;  %3299 = vmatpush3.xpose.msra.mxu1 %v3747_v42  ;;  %v5485_v42 = vand.u32 4294901760, %v5476_v10 }
  0xd3   : > { %3107 = vmatprep.mubr.f32.mxu0 %v5480_v4  ;;  %3181 = vmatprep.mubr.f32.mxu1 %v5481_v34 }
  0xd4   : > { %3224 = vmatprep.subr.mxu0 %v5482_v51  ;;  %3300 = vmatprep.subr.mxu1 %v3764_v50 }
  0xd5   : > { %3108 = vmatmul.mubr.f32.gmra.mxu0 %v5483_v7  ;;  %3182 = vmatmul.mubr.f32.gmra.mxu1 %v5484_v48 }
  0xd6   : > { %3225 = vmatpush3.xpose.msra.mxu0 %v5482_v51  ;;  %3301 = vmatpush3.xpose.msra.mxu1 %v3764_v50  ;;  %v5488_v50 = vand.u32 4294901760, %v5480_v4 }
  0xd7   : > { %3110 = vmatprep.mubr.f32.mxu0 %v4112_v49  ;;  %3184 = vmatprep.mubr.f32.mxu1 %v5485_v42 }
  0xd8   : > { %3226 = vmatprep.subr.mxu0 %v5486_v18  ;;  %3302 = vmatprep.subr.mxu1 %v3777_v57 }
  0xd9   : > { %3111 = vmatmul.mubr.f32.gmra.mxu0 %v4129_v30  ;;  %3185 = vmatmul.mubr.f32.gmra.mxu1 %v5487_v41  ;;  %v5498_v30 = vld [vmem:[#allocation24_spill] sm:$0xff] }
  0xda   : > { %3227 = vmatpush3.xpose.msra.mxu0 %v5486_v18  ;;  %3303 = vmatpush3.xpose.msra.mxu1 %v3777_v57  ;;  %v5491_v57 = vand.u32 4294901760, %v4112_v49  ;;  %v5495_v49 = vld [vmem:[#allocation35_spill] sm:$0xff] }
  0xdb   : > { %3113 = vmatprep.mubr.f32.mxu0 %v4141_v11  ;;  %3187 = vmatprep.mubr.f32.mxu1 %v5488_v50 }
  0xdc   : > { %3228 = vmatprep.subr.mxu0 %v5489_v47  ;;  %3304 = vmatprep.subr.mxu1 %v3790_v63 }
  0xdd   : > { %3114 = vmatmul.mubr.f32.gmra.mxu0 %v4153_v31  ;;  %3188 = vmatmul.mubr.f32.gmra.mxu1 %v5490_v56  ;;  %v5501_v31 = vld [vmem:[#allocation32_spill] sm:$0xff] }
  0xde   : > { %3229 = vmatpush3.xpose.msra.mxu0 %v5489_v47  ;;  %3305 = vmatpush3.xpose.msra.mxu1 %v3790_v63  ;;  %v5494_v63 = vand.u32 4294901760, %v4141_v11  ;;  %v5499_v11 = vld [vmem:[#allocation27_spill] sm:$0xff] }
  0xdf   : > { %3116 = vmatprep.mubr.f32.mxu0 %v4165_v52  ;;  %3190 = vmatprep.mubr.f32.mxu1 %v5491_v57  ;;  %v5503_v52 = vld [vmem:[#allocation36_spill] sm:$0xff] }
  0xe0   : > { %3230 = vmatprep.subr.mxu0 %v5492_v23  ;;  %3306 = vmatprep.subr.mxu1 %v3803_v16 }
  0xe1   : > { %3117 = vmatmul.mubr.f32.gmra.mxu0 %v4177_v21  ;;  %3191 = vmatmul.mubr.f32.gmra.mxu1 %v5493_v5  ;;  %v5502_v21 = vld [vmem:[#allocation34_spill] sm:$0xff] }
  0xe2   : > { %3231 = vmatpush3.xpose.msra.mxu0 %v5492_v23  ;;  %3307 = vmatpush3.xpose.msra.mxu1 %v3803_v16  ;;  %v5497_v16 = vld [vmem:[#allocation13_spill] sm:$0xff] }
  0xe3   : > { %3119 = vmatprep.mubr.f32.mxu0 %v4189_v17  ;;  %3193 = vmatprep.mubr.f32.mxu1 %v5494_v63  ;;  %v5504_v17 = vld [vmem:[#allocation38_spill] sm:$0xff] }
  0xe4   : > { %3232 = vmatprep.subr.mxu0 %v5495_v49  ;;  %3308 = vmatprep.subr.mxu1 %v3816_v26 }
  0xe5   : > { %3120 = vmatmul.mubr.f32.gmra.mxu0 %v4199_v44  ;;  %3194 = vmatmul.mubr.f32.gmra.mxu1 %v5496_v62  ;;  %v5507_v44 = vld [vmem:[#allocation42_spill] sm:$0xff] }
  0xe6   : > { %3233 = vmatpush3.xpose.msra.mxu0 %v5495_v49  ;;  %3309 = vmatpush3.xpose.msra.mxu1 %v3816_v26  ;;  %v5500_v26 = vld [vmem:[#allocation28_spill] sm:$0xff] }
  0xe7   : > { %3196 = vmatprep.mubr.f32.mxu1 %v522_v22  ;;  %3234 = vmatprep.mubr.f32.mxu0 %v5497_v16  ;;  %v5505_v22 = vld [vmem:[#allocation39_spill] sm:$0xff] }
  0xe8   : > { %3310 = vmatprep.subr.mxu1 %v5438_v1 }
  0xe9   : > { %3197 = vmatmul.mubr.f32.gmra.mxu1 %v532_v43  ;;  %3235 = vmatmul.mubr.f32.vlgmr.msra.gmra.mxu0 %v5498_v30  ;;  %v5506_v43 = vld [vmem:[#allocation41_spill] sm:$0xff] }
  0xea   : > { %3311 = vmatpush3.xpose.msra.mxu1 %v5438_v1  ;;  %3199 = vmatprep.mubr.f32.mxu1 %v542_v53  ;;  %v5508_v53 = vld [vmem:[#allocation44_spill] sm:$0xff]  ;;  %v5510_v1 = vld [vmem:[#allocation46_spill] sm:$0xff] }
  0xeb   : > { %3237 = vmatprep.mubr.f32.mxu0 %v5499_v11  ;;  %3312 = vmatprep.subr.mxu1 %v5442_v40 }
  0xed   : > { %3200 = vmatmul.mubr.f32.gmra.mxu1 %v552_v61  ;;  %3238 = vmatmul.mubr.f32.gmra.mxu0 %v5500_v26  ;;  %v5509_v61 = vld [vmem:[#allocation45_spill] sm:$0xff] }
  0xee   : > { %3313 = vmatpush3.xpose.msra.mxu1 %v5442_v40  ;;  %3240 = vmatprep.mubr.f32.mxu0 %v5501_v31  ;;  %v5511_v40 = vld [vmem:[#allocation49_spill] sm:$0xff] }
  0xef   : > { %3314 = vmatprep.mubr.f32.mxu1 %v5497_v16 }
  0xf1   : > { %3241 = vmatmul.mubr.f32.gmra.mxu0 %v5502_v21  ;;  %3315 = vmatmul.mubr.f32.vlgmr.msra.gmra.mxu1 %v5498_v30 }
  0xf2   : > { %3243 = vmatprep.mubr.f32.mxu0 %v5503_v52  ;;  %3317 = vmatprep.mubr.f32.mxu1 %v5499_v11 }
  0xf5   : > { %3244 = vmatmul.mubr.f32.gmra.mxu0 %v5504_v17  ;;  %3318 = vmatmul.mubr.f32.gmra.mxu1 %v5500_v26 }
  0xf6   : > { %3246 = vmatprep.mubr.f32.mxu0 %v5505_v22  ;;  %3320 = vmatprep.mubr.f32.mxu1 %v5501_v31 }
  0xf9   : > { %3247 = vmatmul.mubr.f32.gmra.mxu0 %v5506_v43  ;;  %3321 = vmatmul.mubr.f32.gmra.mxu1 %v5502_v21 }
  0xfa   : > { %3249 = vmatprep.mubr.f32.mxu0 %v5507_v44  ;;  %3323 = vmatprep.mubr.f32.mxu1 %v5503_v52 }
  0xfd   : > { %3250 = vmatmul.mubr.f32.gmra.mxu0 %v5508_v53  ;;  %3324 = vmatmul.mubr.f32.gmra.mxu1 %v5504_v17 }
  0xfe   : > { %3252 = vmatprep.mubr.f32.mxu0 %v5509_v61  ;;  %3326 = vmatprep.mubr.f32.mxu1 %v5505_v22 }
 0x101   : > { %3253 = vmatmul.mubr.f32.gmra.mxu0 %v5510_v1  ;;  %3327 = vmatmul.mubr.f32.gmra.mxu1 %v5506_v43 }
 0x102   : > { %3255 = vmatprep.mubr.f32.mxu0 %v5511_v40  ;;  %3329 = vmatprep.mubr.f32.mxu1 %v5507_v44 }
 0x105   : > { %3256 = vmatmul.mubr.f32.gmra.mxu0 %v3987_v58  ;;  %3330 = vmatmul.mubr.f32.gmra.mxu1 %v5508_v53 }
 0x106   : > { %3258 = vmatprep.mubr.f32.mxu0 %v3991_v60  ;;  %3332 = vmatprep.mubr.f32.mxu1 %v5509_v61 }
 0x109   : > { %3259 = vmatmul.mubr.f32.gmra.mxu0 %v5512_v25  ;;  %3333 = vmatmul.mubr.f32.gmra.mxu1 %v5510_v1 }
 0x10a   : > { %3261 = vmatprep.mubr.f32.mxu0 %v4023_v6  ;;  %3335 = vmatprep.mubr.f32.mxu1 %v5511_v40 }
 0x10d   : > { %3262 = vmatmul.mubr.f32.gmra.mxu0 %v4035_v46  ;;  %3336 = vmatmul.mubr.f32.gmra.mxu1 %v3987_v58 }
 0x10e   : > { %3264 = vmatprep.mubr.f32.mxu0 %v4047_v35  ;;  %3338 = vmatprep.mubr.f32.mxu1 %v3991_v60 }
 0x111   : > { %3265 = vmatmul.mubr.f32.gmra.mxu0 %v4059_v2  ;;  %3339 = vmatmul.mubr.f32.gmra.mxu1 %v5512_v25 }
 0x112   : > { %3267 = vmatprep.mubr.f32.mxu0 %v4071_v38  ;;  %3341 = vmatprep.mubr.f32.mxu1 %v4023_v6 }
 0x115   : > { %3268 = vmatmul.mubr.f32.gmra.mxu0 %v4075_v32  ;;  %3342 = vmatmul.mubr.f32.gmra.mxu1 %v4035_v46 }
 0x116   : > { %3270 = vmatprep.mubr.f32.mxu0 %v4087_v55  ;;  %3344 = vmatprep.mubr.f32.mxu1 %v4047_v35 }
 0x119   : > { %3271 = vmatmul.mubr.f32.gmra.mxu0 %v4107_v36  ;;  %3345 = vmatmul.mubr.f32.gmra.mxu1 %v4059_v2 }
 0x11a   : > { %3273 = vmatprep.mubr.f32.mxu0 %v4119_v45  ;;  %3347 = vmatprep.mubr.f32.mxu1 %v4071_v38 }
 0x11d   : > { %3274 = vmatmul.mubr.f32.gmra.mxu0 %v4131_v9  ;;  %3348 = vmatmul.mubr.f32.gmra.mxu1 %v4075_v32 }
 0x11e   : > { %3276 = vmatprep.mubr.f32.mxu0 %v4143_v19  ;;  %3350 = vmatprep.mubr.f32.mxu1 %v4087_v55 }
 0x121   : > { %3277 = vmatmul.mubr.f32.gmra.mxu0 %v4155_v54  ;;  %3351 = vmatmul.mubr.f32.gmra.mxu1 %v4107_v36 }
 0x122   : > { %3279 = vmatprep.mubr.f32.mxu0 %v4167_v39  ;;  %3353 = vmatprep.mubr.f32.mxu1 %v4119_v45 }
 0x125   : > { %3280 = vmatmul.mubr.f32.gmra.mxu0 %v4179_v14  ;;  %3354 = vmatmul.mubr.f32.gmra.mxu1 %v4131_v9 }
 0x126   : > { %3356 = vmatprep.mubr.f32.mxu1 %v4143_v19 }
 0x129   : > { %v2916_v35 = vpop.f32.mrf.mxu0  ;;  %3357 = vmatmul.mubr.f32.gmra.mxu1 %v4155_v54 }
 0x12a   : > { %3359 = vmatprep.mubr.f32.mxu1 %v4167_v39 }
 0x12b   : > { %v246_v38 = vpop.f32.mrf.mxu0 }
 0x12d   : > { %v2919_v2 = vpop.f32.mrf.mxu0  ;;  %3360 = vmatmul.mubr.f32.gmra.mxu1 %v4179_v14 }
 0x12f   : > { %v266_v6 = vpop.f32.mrf.mxu0 }
 0x131   : > { %v2922_v55 = vpop.f32.mrf.mxu0  ;;  %v2996_v60 = vpop.f32.mrf.mxu1 }
 0x132   : > { %v4473_v58 = vadd.f32 %v2996_v60, %v2916_v35 }
 0x133   : > { %v286_v45 = vpop.f32.mrf.mxu0  ;;  %v707_v46 = vpop.f32.mrf.mxu1 }
 0x134   : > { %v4475_v32 = vadd.f32 %v707_v46, %v246_v38 }
 0x135   : > { %v2925_v9 = vpop.f32.mrf.mxu0  ;;  %v2999_v19 = vpop.f32.mrf.mxu1 }
 0x136   : > { %v4477_v36 = vadd.f32 %v2999_v19, %v2919_v2 }
 0x137   : > { %v306_v54 = vpop.f32.mrf.mxu0  ;;  %v719_v8 = vpop.f32.mrf.mxu1 }
 0x138   : > { %v4479_v39 = vadd.f32 %v719_v8, %v266_v6 }
 0x139   : > { %v2928_v13 = vpop.f32.mrf.mxu0  ;;  %v3002_v59 = vpop.f32.mrf.mxu1 }
 0x13a   : > { %v4481_v14 = vadd.f32 %v3002_v59, %v2922_v55 }
 0x13b   : > { %v326_v37 = vpop.f32.mrf.mxu0  ;;  %v731_v28 = vpop.f32.mrf.mxu1 }
 0x13c   : > { %v4483_v12 = vadd.f32 %v731_v28, %v286_v45 }
 0x13d   : > { %v2931_v0 = vpop.f32.mrf.mxu0  ;;  %v3005_v3 = vpop.f32.mrf.mxu1 }
 0x13e   : > { %v4485_v20 = vadd.f32 %v3005_v3, %v2925_v9 }
 0x13f   : > { %v346_v24 = vpop.f32.mrf.mxu0  ;;  %v743_v29 = vpop.f32.mrf.mxu1 }
 0x140   : > { %v4487_v10 = vadd.f32 %v743_v29, %v306_v54 }
 0x141   : > { %v2934_v27 = vpop.f32.mrf.mxu0  ;;  %v3008_v15 = vpop.f32.mrf.mxu1 }
 0x142   : > { %v4489_v33 = vadd.f32 %v3008_v15, %v2928_v13 }
 0x143   : > { %v366_v4 = vpop.f32.mrf.mxu0  ;;  %v755_v34 = vpop.f32.mrf.mxu1 }
 0x144   : > { %v4491_v51 = vadd.f32 %v755_v34, %v326_v37 }
 0x145   : > { %v2937_v7 = vpop.f32.mrf.mxu0  ;;  %v3011_v48 = vpop.f32.mrf.mxu1 }
 0x146   : > { %v4493_v42 = vadd.f32 %v3011_v48, %v2931_v0 }
 0x147   : > { %v386_v18 = vpop.f32.mrf.mxu0  ;;  %v767_v41 = vpop.f32.mrf.mxu1 }
 0x148   : > { %v4495_v50 = vadd.f32 %v767_v41, %v346_v24 }
 0x149   : > { %v2940_v47 = vpop.f32.mrf.mxu0  ;;  %v3014_v56 = vpop.f32.mrf.mxu1 }
 0x14a   : > { %v4497_v57 = vadd.f32 %v3014_v56, %v2934_v27 }
 0x14b   : > { %v406_v23 = vpop.f32.mrf.mxu0  ;;  %v779_v5 = vpop.f32.mrf.mxu1 }
 0x14c   : > { %v4499_v63 = vadd.f32 %v779_v5, %v366_v4 }
 0x14d   : > { %v2943_v49 = vpop.f32.mrf.mxu0  ;;  %v3017_v62 = vpop.f32.mrf.mxu1 }
 0x14e   : > { %v4501_v16 = vadd.f32 %v3017_v62, %v2937_v7 }
 0x14f   : > { %v426_v30 = vpop.f32.mrf.mxu0  ;;  %v791_v11 = vpop.f32.mrf.mxu1 }
 0x150   : > { %v4503_v26 = vadd.f32 %v791_v11, %v386_v18 }
 0x151   : > { %v2946_v31 = vpop.f32.mrf.mxu0  ;;  %v3020_v21 = vpop.f32.mrf.mxu1 }
 0x152   : > { %v4505_v52 = vadd.f32 %v3020_v21, %v2940_v47 }
 0x153   : > { %v446_v17 = vpop.f32.mrf.mxu0  ;;  %v803_v22 = vpop.f32.mrf.mxu1 }
 0x154   : > { %v4507_v43 = vadd.f32 %v803_v22, %v406_v23 }
 0x155   : > { %v2949_v44 = vpop.f32.mrf.mxu0  ;;  %v3023_v53 = vpop.f32.mrf.mxu1 }
 0x156   : > { %v4509_v61 = vadd.f32 %v3023_v53, %v2943_v49 }
 0x157   : > { %v466_v1 = vpop.f32.mrf.mxu0  ;;  %v815_v40 = vpop.f32.mrf.mxu1 }
 0x158   : > { %v4511_v25 = vadd.f32 %v815_v40, %v426_v30 }
 0x159   : > { %v2952_v35 = vpop.f32.mrf.mxu0  ;;  %v3026_v38 = vpop.f32.mrf.mxu1 }
 0x15a   : > { %v4513_v2 = vadd.f32 %v3026_v38, %v2946_v31 }
 0x15b   : > { %v486_v6 = vpop.f32.mrf.mxu0  ;;  %v827_v55 = vpop.f32.mrf.mxu1 }
 0x15c   : > { %v4515_v60 = vadd.f32 %v827_v55, %v446_v17 }
 0x15d   : > { %v2955_v45 = vpop.f32.mrf.mxu0  ;;  %v3029_v46 = vpop.f32.mrf.mxu1 }
 0x15e   : > { %v4517_v9 = vadd.f32 %v3029_v46, %v2949_v44 }
 0x15f   : > { %v506_v19 = vpop.f32.mrf.mxu0  ;;  %v839_v54 = vpop.f32.mrf.mxu1 }
 0x160   : > { %v4519_v8 = vadd.f32 %v839_v54, %v466_v1 }
 0x161   : > { %v2958_v13 = vpop.f32.mrf.mxu0  ;;  %v3032_v59 = vpop.f32.mrf.mxu1 }
 0x162   : > { %v4521_v37 = vadd.f32 %v3032_v59, %v2952_v35 }
 0x163   : > { %v526_v28 = vpop.f32.mrf.mxu0  ;;  %v851_v0 = vpop.f32.mrf.mxu1 }
 0x164   : > { %v4523_v3 = vadd.f32 %v851_v0, %v486_v6 }
 0x165   : > { %v2961_v24 = vpop.f32.mrf.mxu0  ;;  %v3035_v29 = vpop.f32.mrf.mxu1 }
 0x166   : > { %v4525_v27 = vadd.f32 %v3035_v29, %v2955_v45 }
 0x167   : > { %v546_v15 = vpop.f32.mrf.mxu0  ;;  %v863_v4 = vpop.f32.mrf.mxu1 }
 0x168   : > { %v4527_v34 = vadd.f32 %v863_v4, %v506_v19 }
 0x169   : > { %v3038_v7 = vpop.f32.mrf.mxu1  ;;  %v3076_v48 = vpop.f32.mrf.mxu0 }
 0x16a   : > { %v4529_v18 = vadd.f32 %v3038_v7, %v2958_v13  ;;  %v1005_v41 = vadd.f32 %v3076_v48, %v4473_v58 }
 0x16b   : > { %v875_v47 = vpop.f32.mrf.mxu1  ;;  %v997_v56 = vpop.f32.mrf.mxu0 }
 0x16c   : > { %v4532_v23 = vadd.f32 %v875_v47, %v526_v28  ;;  %v998_v5 = vadd.f32 %v997_v56, %v4475_v32 }
 0x16d   : > { %v3041_v49 = vpop.f32.mrf.mxu1  ;;  %v3079_v62 = vpop.f32.mrf.mxu0 }
 0x16e   : > { %v4535_v30 = vadd.f32 %v3041_v49, %v2961_v24  ;;  %v1019_v11 = vadd.f32 %v3079_v62, %v4477_v36 }
 0x16f   : > { %v887_v31 = vpop.f32.mrf.mxu1  ;;  %v1011_v21 = vpop.f32.mrf.mxu0 }
 0x170   : > { %v4538_v17 = vadd.f32 %v887_v31, %v546_v15  ;;  %v1012_v22 = vadd.f32 %v1011_v21, %v4479_v39 }
 0x171   : > { %v3082_v44 = vpop.f32.mrf.mxu0  ;;  %v3156_v58 = vpop.f32.mrf.mxu1 }
 0x172   : > { %v1033_v53 = vadd.f32 %v3082_v44, %v4481_v14  ;;  %v4542_v1 = vadd.f32 %v3156_v58, %v1005_v41 }
 0x173   : > { %v1025_v40 = vpop.f32.mrf.mxu0  ;;  %v1303_v32 = vpop.f32.mrf.mxu1 }
 0x174   : > { %v1026_v35 = vadd.f32 %v1025_v40, %v4483_v12  ;;  %v4545_v38 = vadd.f32 %v1303_v32, %v998_v5 }
 0x175   : > { %v3085_v6 = vpop.f32.mrf.mxu0  ;;  %v3159_v36 = vpop.f32.mrf.mxu1 }
 0x176   : > { %v1047_v55 = vadd.f32 %v3085_v6, %v4485_v20  ;;  %v4548_v45 = vadd.f32 %v3159_v36, %v1019_v11 }
 0x177   : > { %v1039_v46 = vpop.f32.mrf.mxu0  ;;  %v1319_v39 = vpop.f32.mrf.mxu1 }
 0x178   : > { %v1040_v19 = vadd.f32 %v1039_v46, %v4487_v10  ;;  %v4551_v54 = vadd.f32 %v1319_v39, %v1012_v22 }
 0x179   : > { %v3088_v14 = vpop.f32.mrf.mxu0  ;;  %v3162_v13 = vpop.f32.mrf.mxu1 }
 0x17a   : > { %v1061_v59 = vadd.f32 %v3088_v14, %v4489_v33  ;;  %v4554_v28 = vadd.f32 %v3162_v13, %v1033_v53 }
 0x17b   : > { %v1053_v12 = vpop.f32.mrf.mxu0  ;;  %v1335_v0 = vpop.f32.mrf.mxu1 }
 0x17c   : > { %v1054_v24 = vadd.f32 %v1053_v12, %v4491_v51  ;;  %v4557_v29 = vadd.f32 %v1335_v0, %v1026_v35 }
 0x17d   : > { %v3091_v20 = vpop.f32.mrf.mxu0  ;;  %v3165_v15 = vpop.f32.mrf.mxu1 }
 0x17e   : > { %v1075_v4 = vadd.f32 %v3091_v20, %v4493_v42  ;;  %v4560_v7 = vadd.f32 %v3165_v15, %v1047_v55 }
 0x17f   : > { %v1067_v10 = vpop.f32.mrf.mxu0  ;;  %v1351_v48 = vpop.f32.mrf.mxu1 }
 0x180   : > { %v1068_v41 = vadd.f32 %v1067_v10, %v4495_v50  ;;  %v4563_v47 = vadd.f32 %v1351_v48, %v1040_v19 }
 0x181   : > { %v3094_v33 = vpop.f32.mrf.mxu0  ;;  %v3168_v56 = vpop.f32.mrf.mxu1 }
 0x182   : > { %v1089_v5 = vadd.f32 %v3094_v33, %v4497_v57  ;;  %v4566_v49 = vadd.f32 %v3168_v56, %v1061_v59 }
 0x183   : > { %v1081_v51 = vpop.f32.mrf.mxu0  ;;  %v1367_v62 = vpop.f32.mrf.mxu1 }
 0x184   : > { %v1082_v11 = vadd.f32 %v1081_v51, %v4499_v63  ;;  %v4569_v31 = vadd.f32 %v1367_v62, %v1054_v24 }
 0x185   : > { %v3097_v42 = vpop.f32.mrf.mxu0  ;;  %v3171_v21 = vpop.f32.mrf.mxu1 }
 0x186   : > { %v1103_v22 = vadd.f32 %v3097_v42, %v4501_v16  ;;  %v4572_v44 = vadd.f32 %v3171_v21, %v1075_v4 }
 0x187   : > { %v1095_v50 = vpop.f32.mrf.mxu0  ;;  %v1383_v58 = vpop.f32.mrf.mxu1 }
 0x188   : > { %v1096_v53 = vadd.f32 %v1095_v50, %v4503_v26  ;;  %v4575_v40 = vadd.f32 %v1383_v58, %v1068_v41 }
 0x189   : > { %v3100_v57 = vpop.f32.mrf.mxu0  ;;  %v3174_v32 = vpop.f32.mrf.mxu1 }
 0x18a   : > { %v1117_v35 = vadd.f32 %v3100_v57, %v4505_v52  ;;  %v4578_v6 = vadd.f32 %v3174_v32, %v1089_v5 }
 0x18b   : > { %v1109_v63 = vpop.f32.mrf.mxu0  ;;  %v1399_v36 = vpop.f32.mrf.mxu1 }
 0x18c   : > { %v1110_v55 = vadd.f32 %v1109_v63, %v4507_v43  ;;  %v4581_v46 = vadd.f32 %v1399_v36, %v1082_v11 }
 0x18d   : > { %v3103_v16 = vpop.f32.mrf.mxu0  ;;  %v3177_v39 = vpop.f32.mrf.mxu1 }
 0x18e   : > { %v1131_v19 = vadd.f32 %v3103_v16, %v4509_v61  ;;  %v4584_v14 = vadd.f32 %v3177_v39, %v1103_v22 }
 0x18f   : > { %v1123_v26 = vpop.f32.mrf.mxu0  ;;  %v1415_v13 = vpop.f32.mrf.mxu1 }
 0x190   : > { %v1124_v59 = vadd.f32 %v1123_v26, %v4511_v25  ;;  %v4587_v12 = vadd.f32 %v1415_v13, %v1096_v53  ;;  %v2133_v53 = vlaneseq }
 0x191   : > { %v3106_v52 = vpop.f32.mrf.mxu0  ;;  %v3180_v0 = vpop.f32.mrf.mxu1 }
 0x192   : > { %v1145_v24 = vadd.f32 %v3106_v52, %v4513_v2  ;;  %v4590_v20 = vadd.f32 %v3180_v0, %v1117_v35  ;;  %v2167_v16 = vand.u32 127, %v2133_v53 }
 0x193   : > { %v1137_v43 = vpop.f32.mrf.mxu0  ;;  %v1431_v15 = vpop.f32.mrf.mxu1 }
 0x194   : > { %v1138_v4 = vadd.f32 %v1137_v43, %v4515_v60  ;;  %v4593_v10 = vadd.f32 %v1431_v15, %v1110_v55 }
 0x195   : > { %v3109_v61 = vpop.f32.mrf.mxu0  ;;  %v3183_v48 = vpop.f32.mrf.mxu1 }
 0x196   : > { %v1159_v41 = vadd.f32 %v3109_v61, %v4517_v9  ;;  %v4596_v33 = vadd.f32 %v3183_v48, %v1131_v19  ;;  %v2168_v19 = vstv %s2589_s26 }
 0x197   : > { %v1151_v25 = vpop.f32.mrf.mxu0  ;;  %v1447_v56 = vpop.f32.mrf.mxu1  ;;  %v4623_v0 = vadd.s32 %v2168_v19, %v2167_v16 }
 0x198   : > { %v1152_v5 = vadd.f32 %v1151_v25, %v4519_v8  ;;  %v4599_v51 = vadd.f32 %v1447_v56, %v1124_v59 }
 0x199   : > { %v3112_v2 = vpop.f32.mrf.mxu0  ;;  %v3186_v62 = vpop.f32.mrf.mxu1 }
 0x19a   : > { %v1173_v11 = vadd.f32 %v3112_v2, %v4521_v37  ;;  %v4602_v42 = vadd.f32 %v3186_v62, %v1145_v24  ;;  %v4638_v62 = vshrl.u32 %v2133_v53, 7 }
 0x19b   : > { %v1165_v60 = vpop.f32.mrf.mxu0  ;;  %v1463_v21 = vpop.f32.mrf.mxu1 }
 0x19c   : > { %v1166_v22 = vadd.f32 %v1165_v60, %v4523_v3  ;;  %v4605_v9 = vadd.f32 %v1463_v21, %v1138_v4  ;;  %v4652_v53 = vadd.s32 16, %v4638_v62 }
 0x19d   : > { %v3115_v50 = vpop.f32.mrf.mxu0  ;;  %v3189_v58 = vpop.f32.mrf.mxu1 }
 0x19e   : > { %v1187_v8 = vadd.f32 %v3115_v50, %v4525_v27  ;;  %v4608_v57 = vadd.f32 %v3189_v58, %v1159_v41  ;;  %v4643_v58 = vadd.s32 8, %v4638_v62  ;;  %5514 = vst [vmem:[#allocation22_spill] sm:$0xff] %v4652_v53 }
 0x19f   : > { %v1179_v32 = vpop.f32.mrf.mxu0  ;;  %v1479_v35 = vpop.f32.mrf.mxu1 }
 0x1a0   : > { %v1180_v37 = vadd.f32 %v1179_v32, %v4527_v34  ;;  %v4611_v63 = vadd.f32 %v1479_v35, %v1152_v5  ;;  %5513 = vst [vmem:[#allocation15_spill] sm:$0xff] %v4643_v58 }
 0x1a1   : > { %v3118_v36 = vpop.f32.mrf.mxu0  ;;  %v3192_v55 = vpop.f32.mrf.mxu1 }
 0x1a2   : > { %v1201_v3 = vadd.f32 %v3118_v36, %v4529_v18  ;;  %v4614_v39 = vadd.f32 %v3192_v55, %v1173_v11 }
 0x1a3   : > { %v1193_v26 = vpop.f32.mrf.mxu0  ;;  %v1495_v13 = vpop.f32.mrf.mxu1 }
 0x1a4   : > { %v1194_v27 = vadd.f32 %v1193_v26, %v4532_v23  ;;  %v4619_v59 = vadd.f32 %v1495_v13, %v1166_v22  ;;  %v2202_v23 = vadd.s32 128, %v4623_v0 }
 0x1a5   : > { %v4621_v52 = vpop.f32.mrf.mxu0  ;;  %v3195_v34 = vpop.f32.mrf.mxu1 }
 0x1a6   : > { %v4625_v24 = vadd.f32 %v3195_v34, %v1187_v8  ;;  %v2590_v11 = vadd.s32 4294967040, %v2202_v23  ;;  %vm2203_vm0 = vcmp.ge.s32.totalorder %v2202_v23, 256 }
 0x1a7   : > { %v4627_v43 = vpop.f32.mrf.mxu0  ;;  %v1511_v18 = vpop.f32.mrf.mxu1 }
 0x1a8   : > { %v4629_v15 = vadd.f32 %v1511_v18, %v1180_v37  ;;  %v4647_v35 = vsel %vm2203_vm0, %v2590_v11, %v2202_v23  ;;  %v4669_v18 = vadd.s32 32, %v4638_v62 }
 0x1a9   : > { %v3198_v4 = vpop.f32.mrf.mxu1  ;;  %v3236_v61 = vpop.f32.mrf.mxu0  ;;  %vm2206_vm1 = vcmp.eq.s32.totalorder %v4638_v62, %v4647_v35  ;;  %vm2207_vm2 = vcmp.eq.s32.totalorder %v4643_v58, %v4647_v35  ;;  %vm2208_vm3 = vcmp.eq.s32.totalorder %v4652_v53, %v4647_v35 }
 0x1aa   : > { %v4631_v48 = vadd.f32 %v3198_v4, %v1201_v3  ;;  %v1677_v8 = vadd.f32 %v3236_v61, %v4542_v1  ;;  %5516 = vst [vmem:[#allocation29_spill] sm:$0xff] %v4669_v18  ;;  %vm2210_vm5 = vcmp.eq.s32.totalorder %v4669_v18, %v4647_v35 }
 0x1ab   : > { %v1527_v41 = vpop.f32.mrf.mxu1  ;;  %v1670_v25 = vpop.f32.mrf.mxu0 }
 0x1ac   : > { %v4634_v56 = vadd.f32 %v1527_v41, %v1194_v27  ;;  %v1671_v32 = vadd.f32 %v1670_v25, %v4545_v38  ;;  %v4661_v38 = vadd.s32 24, %v4638_v62  ;;  %v4679_v25 = vadd.s32 40, %v4638_v62 }
 0x1ad   : > { %v4636_v5 = vpop.f32.mrf.mxu1  ;;  %v3239_v2 = vpop.f32.mrf.mxu0 }
 0x1ae   : > { %5515 = vst [vmem:[#allocation8_spill] sm:$0xff] %v4661_v38  ;;  %v1689_v19 = vadd.f32 %v3239_v2, %v4548_v45  ;;  %vm2209_vm4 = vcmp.eq.s32.totalorder %v4661_v38, %v4647_v35  ;;  %5517 = vst [vmem:[#allocation31_spill] sm:$0xff] %v4679_v25  ;;  %vm2211_vm6 = vcmp.eq.s32.totalorder %v4679_v25, %v4647_v35 }
 0x1af   : > { %v4640_v60 = vpop.f32.mrf.mxu1  ;;  %v1682_v21 = vpop.f32.mrf.mxu0 }
 0x1b0   : > { %v1683_v26 = vadd.f32 %v1682_v21, %v4551_v54 }
 0x1b1   : > { %v3242_v22 = vpop.f32.mrf.mxu0  ;;  %v3316_v50 = vpop.f32.mrf.mxu1 }
 0x1b2   : > { %v4654_v55 = vadd.f32 %v3316_v50, %v1677_v8  ;;  %v1701_v2 = vadd.f32 %v3242_v22, %v4554_v28 }
 0x1b3   : > { %v1694_v37 = vpop.f32.mrf.mxu0  ;;  %v1943_v36 = vpop.f32.mrf.mxu1 }
 0x1b4   : > { %v4656_v16 = vadd.f32 %v1943_v36, %v1671_v32  ;;  %v2444_v4 = vsel %vm2207_vm2, %v4654_v55, 0.0  ;;  %v1695_v11 = vadd.f32 %v1694_v37, %v4557_v29  ;;  %v4687_v36 = vadd.s32 48, %v4638_v62 }
 0x1b5   : > { %v3245_v1 = vpop.f32.mrf.mxu0  ;;  %v3319_v3 = vpop.f32.mrf.mxu1  ;;  %v4697_v37 = vadd.s32 56, %v4638_v62 }
 0x1b6   : > { %v2443_v13 = vsel %vm2206_vm1, %v4656_v16, 0.0  ;;  %v4672_v61 = vadd.f32 %v3319_v3, %v1689_v19  ;;  %5518 = vst [vmem:[#allocation25_spill] sm:$0xff] %v4687_v36  ;;  %vm2212_vm7 = vcmp.eq.s32.totalorder %v4687_v36, %v4647_v35 }
 0x1b7   : > { %v1706_v27 = vpop.f32.mrf.mxu0  ;;  %v1955_v34 = vpop.f32.mrf.mxu1  ;;  %v2475_v41 = vadd.f32 %v2444_v4, %v2443_v13  ;;  %5519 = vst [vmem:[#allocation9_spill] sm:$0xff] %v4697_v37  ;;  %v1713_v13 = vadd.f32 %v3245_v1, %v4560_v7  ;;  %vm2213_vm8 = vcmp.eq.s32.totalorder %v4697_v37, %v4647_v35  ;;  %v4745_v37 = vadd.s32 120, %v4638_v62 }
 0x1b8   : > { %v4674_v23 = vadd.f32 %v1955_v34, %v1683_v26  ;;  %v2446_v3 = vsel %vm2209_vm4, %v4672_v61, 0.0  ;;  %v1707_v34 = vadd.f32 %v1706_v27, %v4563_v47 }
 0x1b9   : > { %v3248_v45 = vpop.f32.mrf.mxu0  ;;  %v3322_v54 = vpop.f32.mrf.mxu1  ;;  %5525 = vst [vmem:[#allocation12_spill] sm:$0xff] %v4745_v37  ;;  %vm2221_vm15 = vcmp.eq.s32.totalorder %v4745_v37, %v4647_v35 }
 0x1ba   : > { %v2445_v21 = vsel %vm2208_vm3, %v4674_v23, 0.0  ;;  %v4690_v19 = vadd.f32 %v3322_v54, %v1701_v2 }
 0x1bb   : > { %v2476_v50 = vadd.f32 %v2475_v41, %v2445_v21  ;;  %v1718_v8 = vpop.f32.mrf.mxu0  ;;  %v1967_v32 = vpop.f32.mrf.mxu1  ;;  %v4703_v41 = vadd.s32 72, %v4638_v62  ;;  %v4708_v21 = vadd.s32 64, %v4638_v62 }
 0x1bc   : > { %v4692_v26 = vadd.f32 %v1967_v32, %v1695_v11  ;;  %v2448_v7 = vsel %vm2211_vm6, %v4690_v19, 0.0 }
 0x1bd   : > { %v2477_v28 = vadd.f32 %v2476_v50, %v2446_v3  ;;  %v3251_v29 = vpop.f32.mrf.mxu0  ;;  %v3325_v22 = vpop.f32.mrf.mxu1  ;;  %5520 = vst [vmem:[#allocation33_spill] sm:$0xff] %v4703_v41  ;;  %5521 = vst [vmem:[#allocation10_spill] sm:$0xff] %v4708_v21  ;;  %v4711_v50 = vadd.s32 88, %v4638_v62  ;;  %vm2215_vm9 = vcmp.eq.s32.totalorder %v4703_v41, %v4647_v35  ;;  %vm2214_vm10 = vcmp.eq.s32.totalorder %v4708_v21, %v4647_v35 }
 0x1be   : > { %v2447_v4 = vsel %vm2210_vm5, %v4692_v26, 0.0  ;;  %v4714_v47 = vadd.f32 %v3325_v22, %v1713_v13 }
 0x1bf   : > { %v2478_v54 = vadd.f32 %v2477_v28, %v2447_v4  ;;  %v1730_v2 = vpop.f32.mrf.mxu0  ;;  %v1979_v11 = vpop.f32.mrf.mxu1  ;;  %5522 = vst [vmem:[#allocation37_spill] sm:$0xff] %v4711_v50  ;;  %v1725_v28 = vadd.f32 %v3248_v45, %v4566_v49  ;;  %v1719_v4 = vadd.f32 %v1718_v8, %v4569_v31  ;;  %vm2217_vm11 = vcmp.eq.s32.totalorder %v4711_v50, %v4647_v35 }
 0x1c0   : > { %v4716_v1 = vadd.f32 %v1979_v11, %v1707_v34  ;;  %v4730_v34 = vadd.s32 80, %v4638_v62  ;;  %v1737_v49 = vadd.f32 %v3251_v29, %v4572_v44  ;;  %v2450_v31 = vsel %vm2213_vm8, %v4714_v47, 0.0 }
 0x1c1   : > { %v2479_v27 = vadd.f32 %v2478_v54, %v2448_v7  ;;  %v3254_v32 = vpop.f32.mrf.mxu0  ;;  %v3328_v3 = vpop.f32.mrf.mxu1  ;;  %v4739_v7 = vadd.s32 104, %v4638_v62  ;;  %v1731_v44 = vadd.f32 %v1730_v2, %v4575_v40  ;;  %v4784_v50 = vadd.s32 136, %v4638_v62 }
 0x1c2   : > { %v2449_v36 = vsel %vm2212_vm7, %v4716_v1, 0.0  ;;  %5523 = vst [vmem:[#allocation40_spill] sm:$0xff] %v4730_v34  ;;  %v4734_v45 = vadd.f32 %v3328_v3, %v1725_v28  ;;  %vm2216_vm12 = vcmp.eq.s32.totalorder %v4730_v34, %v4647_v35 }
 0x1c3   : > { %v2480_v25 = vadd.f32 %v2479_v27, %v2449_v36  ;;  %v1742_v22 = vpop.f32.mrf.mxu0  ;;  %v1991_v13 = vpop.f32.mrf.mxu1  ;;  %5524 = vst [vmem:[#allocation11_spill] sm:$0xff] %v4739_v7  ;;  %v4742_v27 = vadd.s32 96, %v4638_v62  ;;  %vm2219_vm13 = vcmp.eq.s32.totalorder %v4739_v7, %v4647_v35  ;;  %5527 = vst [vmem:[#allocation14_spill] sm:$0xff] %v4784_v50  ;;  %vm2223_vm1 = vcmp.eq.s32.totalorder %v4784_v50, %v4647_v35 }
 0x1c4   : > { %v4736_v8 = vadd.f32 %v1991_v13, %v1719_v4  ;;  %v4754_v13 = vadd.s32 112, %v4638_v62  ;;  %v2452_v40 = vsel %vm2215_vm9, %v4734_v45, 0.0 }
 0x1c5   : > { %v2481_v36 = vadd.f32 %v2480_v25, %v2450_v31  ;;  %v3257_v54 = vpop.f32.mrf.mxu0  ;;  %v3331_v11 = vpop.f32.mrf.mxu1  ;;  %v1749_v31 = vadd.f32 %v3254_v32, %v4578_v6  ;;  %vm2218_vm14 = vcmp.eq.s32.totalorder %v4742_v27, %v4647_v35  ;;  %v2238_v6 = vmax.f32 %v4656_v16, %v4692_v26 }
 0x1c6   : > { %v2451_v29 = vsel %vm2214_vm10, %v4736_v8, 0.0  ;;  %v4749_v3 = vadd.f32 %v3331_v11, %v1737_v49  ;;  %5526 = vst [vmem:[#allocation43_spill] sm:$0xff] %v4754_v13  ;;  %v1743_v32 = vadd.f32 %v1742_v22, %v4581_v46  ;;  %vm2220_vm0 = vcmp.eq.s32.totalorder %v4754_v13, %v4647_v35 }
 0x1c7   : > { %v2482_v28 = vadd.f32 %v2481_v36, %v2451_v29  ;;  %v1754_v4 = vpop.f32.mrf.mxu0  ;;  %v2003_v25 = vpop.f32.mrf.mxu1  ;;  %v2242_v34 = vmax.f32 %v2238_v6, %v4736_v8  ;;  %v1761_v46 = vadd.f32 %v3257_v54, %v4584_v14 }
 0x1c8   : > { %v2454_v2 = vsel %vm2217_vm11, %v4749_v3, 0.0  ;;  %v4765_v49 = vadd.f32 %v2003_v25, %v1731_v44  ;;  %v1755_v38 = vadd.f32 %v1754_v4, %v4587_v12 }
 0x1c9   : > { %v2483_v36 = vadd.f32 %v2482_v28, %v2452_v40  ;;  %v3260_v11 = vpop.f32.mrf.mxu0  ;;  %v3334_v29 = vpop.f32.mrf.mxu1  ;;  %v2241_v28 = vmax.f32 %v4672_v61, %v4714_v47 }
 0x1ca   : > { %v2453_v44 = vsel %vm2216_vm12, %v4765_v49, 0.0  ;;  %v4777_v25 = vadd.f32 %v3334_v29, %v1749_v31  ;;  %v2239_v29 = vmax.f32 %v4654_v55, %v4690_v19  ;;  %v1773_v12 = vadd.f32 %v3260_v11, %v4590_v20 }
 0x1cb   : > { %v2484_v40 = vadd.f32 %v2483_v36, %v2453_v44  ;;  %v1766_v41 = vpop.f32.mrf.mxu0  ;;  %v2015_v7 = vpop.f32.mrf.mxu1  ;;  %v2240_v36 = vmax.f32 %v4674_v23, %v4716_v1  ;;  %v2245_v44 = vmax.f32 %v2241_v28, %v4749_v3 }
 0x1cc   : > { %v2456_v22 = vsel %vm2219_vm13, %v4777_v25, 0.0  ;;  %v4789_v31 = vadd.f32 %v2015_v7, %v1743_v32  ;;  %v2243_v7 = vmax.f32 %v2239_v29, %v4734_v45  ;;  %v1767_v20 = vadd.f32 %v1766_v41, %v4593_v10 }
 0x1cd   : > { %v2485_v21 = vadd.f32 %v2484_v40, %v2454_v2  ;;  %v3263_v18 = vpop.f32.mrf.mxu0  ;;  %v3337_v53 = vpop.f32.mrf.mxu1  ;;  %v2244_v32 = vmax.f32 %v2240_v36, %v4765_v49  ;;  %v4807_v40 = vadd.s32 128, %v4638_v62 }
 0x1ce   : > { %v2246_v6 = vmax.f32 %v2242_v34, %v4789_v31  ;;  %v2455_v14 = vsel %vm2218_vm14, %v4789_v31, 0.0  ;;  %v4802_v54 = vadd.f32 %v3337_v53, %v1761_v46  ;;  %v2247_v46 = vmax.f32 %v2243_v7, %v4777_v25 }
 0x1cf   : > { %v2486_v58 = vadd.f32 %v2485_v21, %v2455_v14  ;;  %v1778_v28 = vpop.f32.mrf.mxu0  ;;  %v2027_v2 = vpop.f32.mrf.mxu1  ;;  %5528 = vst [vmem:[#allocation47_spill] sm:$0xff] %v4807_v40  ;;  %v4821_v14 = vadd.s32 152, %v4638_v62  ;;  %vm2222_vm2 = vcmp.eq.s32.totalorder %v4807_v40, %v4647_v35  ;;  %v1785_v10 = vadd.f32 %v3263_v18, %v4596_v33 }
 0x1d0   : > { %v2249_v34 = vmax.f32 %v2245_v44, %v4802_v54  ;;  %v2458_v53 = vsel %vm2221_vm15, %v4802_v54, 0.0  ;;  %v4815_v4 = vadd.f32 %v2027_v2, %v1755_v38  ;;  %v4834_v2 = vadd.s32 144, %v4638_v62 }
 0x1d1   : > { %v2487_v29 = vadd.f32 %v2486_v58, %v2456_v22  ;;  %v3266_v21 = vpop.f32.mrf.mxu0  ;;  %v3340_v36 = vpop.f32.mrf.mxu1  ;;  %5529 = vst [vmem:[#allocation48_spill] sm:$0xff] %v4821_v14  ;;  %vm2225_vm3 = vcmp.eq.s32.totalorder %v4821_v14, %v4647_v35  ;;  %v1779_v40 = vadd.f32 %v1778_v28, %v4599_v51 }
 0x1d2   : > { %v2248_v11 = vmax.f32 %v2244_v32, %v4815_v4  ;;  %v2457_v38 = vsel %vm2220_vm0, %v4815_v4, 0.0  ;;  %v4829_v44 = vadd.f32 %v3340_v36, %v1773_v12  ;;  %5530 = vst [vmem:[#allocation16_spill] sm:$0xff] %v4834_v2  ;;  %vm2224_vm4 = vcmp.eq.s32.totalorder %v4834_v2, %v4647_v35 }
 0x1d3   : > { %v2488_v58 = vadd.f32 %v2487_v29, %v2457_v38  ;;  %v1790_v22 = vpop.f32.mrf.mxu0  ;;  %v2039_v7 = vpop.f32.mrf.mxu1  ;;  %v4846_v38 = vadd.s32 168, %v4638_v62  ;;  %v1797_v14 = vadd.f32 %v3266_v21, %v4602_v42 }
 0x1d4   : > { %v4838_v41 = vmax.f32 %v2247_v46, %v4829_v44  ;;  %v2460_v32 = vsel %vm2223_vm1, %v4829_v44, 0.0  ;;  %v4841_v50 = vadd.f32 %v2039_v7, %v1767_v20  ;;  %v1791_v2 = vadd.f32 %v1790_v22, %v4605_v9 }
 0x1d5   : > { %v2489_v12 = vadd.f32 %v2488_v58, %v2458_v53  ;;  %v3269_v36 = vpop.f32.mrf.mxu0  ;;  %v3343_v29 = vpop.f32.mrf.mxu1  ;;  %5531 = vst [vmem:[#allocation17_spill] sm:$0xff] %v4846_v38  ;;  %v4858_v58 = vadd.s32 160, %v4638_v62  ;;  %vm2227_vm5 = vcmp.eq.s32.totalorder %v4846_v38, %v4647_v35 }
 0x1d6   : > { %v4850_v33 = vmax.f32 %v2246_v6, %v4841_v50  ;;  %v2459_v18 = vsel %vm2222_vm2, %v4841_v50, 0.0  ;;  %v4853_v46 = vadd.f32 %v3343_v29, %v1785_v10  ;;  %v1809_v38 = vadd.f32 %v3269_v36, %v4608_v57 }
 0x1d7   : > { %v2490_v20 = vadd.f32 %v2489_v12, %v2459_v18  ;;  %v1802_v7 = vpop.f32.mrf.mxu0  ;;  %v2051_v53 = vpop.f32.mrf.mxu1  ;;  %5532 = vst [vmem:[#allocation50_spill] sm:$0xff] %v4858_v58  ;;  %v4870_v18 = vadd.s32 184, %v4638_v62  ;;  %vm2226_vm6 = vcmp.eq.s32.totalorder %v4858_v58, %v4647_v35 }
 0x1d8   : > { %v4862_v51 = vmax.f32 %v2249_v34, %v4853_v46  ;;  %v2462_v6 = vsel %vm2225_vm3, %v4853_v46, 0.0  ;;  %v4865_v28 = vadd.f32 %v2051_v53, %v1779_v40  ;;  %v1803_v58 = vadd.f32 %v1802_v7, %v4611_v63 }
 0x1d9   : > { %v2491_v10 = vadd.f32 %v2490_v20, %v2460_v32  ;;  %v3272_v29 = vpop.f32.mrf.mxu0  ;;  %v3346_v12 = vpop.f32.mrf.mxu1  ;;  %5533 = vst [vmem:[#allocation52_spill] sm:$0xff] %v4870_v18  ;;  %v4882_v20 = vadd.s32 176, %v4638_v62  ;;  %vm2229_vm7 = vcmp.eq.s32.totalorder %v4870_v18, %v4647_v35  ;;  %vm2170_vm3 = vcmp.eq.s32.totalorder %v4638_v62, %v4623_v0 }
 0x1da   : > { %v4874_v42 = vmax.f32 %v2248_v11, %v4865_v28  ;;  %v2461_v34 = vsel %vm2224_vm4, %v4865_v28, 0.0  ;;  %v4877_v21 = vadd.f32 %v3346_v12, %v1797_v14  ;;  %v1821_v18 = vadd.f32 %v3272_v29, %v4614_v39 }
 0x1db   : > { %v2492_v40 = vadd.f32 %v2491_v10, %v2461_v34  ;;  %v1814_v53 = vpop.f32.mrf.mxu0  ;;  %v2063_v32 = vpop.f32.mrf.mxu1  ;;  %5534 = vst [vmem:[#allocation18_spill] sm:$0xff] %v4882_v20  ;;  %v4893_v34 = vadd.s32 200, %v4638_v62  ;;  %vm2228_vm8 = vcmp.eq.s32.totalorder %v4882_v20, %v4647_v35  ;;  %v4918_v20 = vadd.s32 208, %v4638_v62 }
 0x1dc   : > { %v2255_v9 = vmax.f32 %v4838_v41, %v4877_v21  ;;  %v2464_v11 = vsel %vm2227_vm5, %v4877_v21, 0.0  ;;  %v4888_v22 = vadd.f32 %v2063_v32, %v1791_v2  ;;  %v1815_v39 = vadd.f32 %v1814_v53, %v4619_v59 }
 0x1dd   : > { %v2493_v14 = vadd.f32 %v2492_v40, %v2462_v6  ;;  %v3275_v12 = vpop.f32.mrf.mxu0  ;;  %v3349_v10 = vpop.f32.mrf.mxu1  ;;  %5535 = vst [vmem:[#allocation19_spill] sm:$0xff] %v4893_v34  ;;  %v4904_v40 = vadd.s32 192, %v4638_v62  ;;  %vm2231_vm9 = vcmp.eq.s32.totalorder %v4893_v34, %v4647_v35  ;;  %v4929_v34 = vadd.s32 232, %v4638_v62 }
 0x1de   : > { %v2254_v57 = vmax.f32 %v4850_v33, %v4888_v22  ;;  %v2463_v41 = vsel %vm2226_vm6, %v4888_v22, 0.0  ;;  %v4899_v36 = vadd.f32 %v3349_v10, %v1809_v38  ;;  %v1833_v37 = vadd.f32 %v3275_v12, %v4625_v24 }
 0x1df   : > { %v2494_v2 = vadd.f32 %v2493_v14, %v2463_v41  ;;  %v1826_v32 = vpop.f32.mrf.mxu0  ;;  %v2075_v6 = vpop.f32.mrf.mxu1  ;;  %v4915_v41 = vadd.s32 216, %v4638_v62  ;;  %vm2230_vm10 = vcmp.eq.s32.totalorder %v4904_v40, %v4647_v35  ;;  %vm2232_vm12 = vcmp.eq.s32.totalorder %v4918_v20, %v4647_v35 }
 0x1e0   : > { %v2257_v63 = vmax.f32 %v4862_v51, %v4899_v36  ;;  %v2466_v33 = vsel %vm2229_vm7, %v4899_v36, 0.0  ;;  %v4910_v7 = vadd.f32 %v2075_v6, %v1803_v58  ;;  %vm2235_vm13 = vcmp.eq.s32.totalorder %v4929_v34, %v4647_v35 }
 0x1e1   : > { %v2495_v38 = vadd.f32 %v2494_v2, %v2464_v11  ;;  %v3278_v10 = vpop.f32.mrf.mxu0  ;;  %v3352_v14 = vpop.f32.mrf.mxu1  ;;  %vm2233_vm11 = vcmp.eq.s32.totalorder %v4915_v41, %v4647_v35 }
 0x1e2   : > { %v2256_v51 = vmax.f32 %v4874_v42, %v4910_v7  ;;  %v2465_v58 = vsel %vm2228_vm8, %v4910_v7, 0.0  ;;  %v4924_v29 = vadd.f32 %v3352_v14, %v1821_v18 }
 0x1e3   : > { %v2496_v11 = vadd.f32 %v2495_v38, %v2465_v58  ;;  %v1838_v2 = vpop.f32.mrf.mxu0  ;;  %v2087_v6 = vpop.f32.mrf.mxu1  ;;  %v1827_v38 = vadd.f32 %v1826_v32, %v4629_v15  ;;  %v1845_v15 = vadd.f32 %v3278_v10, %v4631_v48 }
 0x1e4   : > { %v2259_v59 = vmax.f32 %v2255_v9, %v4924_v29  ;;  %v2468_v53 = vsel %vm2231_vm9, %v4924_v29, 0.0  ;;  %v4934_v42 = vadd.f32 %v2087_v6, %v1815_v39  ;;  %v1215_v9 = vadd.f32 %v4621_v52, %v4535_v30 }
 0x1e5   : > { %v2497_v13 = vadd.f32 %v2496_v11, %v2466_v33  ;;  %v3355_v18 = vpop.f32.mrf.mxu1  ;;  %v3281_v33 = vpop.f32.mrf.mxu0  ;;  %v4950_v11 = vadd.s32 224, %v4638_v62  ;;  %v1208_v30 = vadd.f32 %v4627_v43, %v4538_v17 }
 0x1e6   : > { %v2258_v14 = vmax.f32 %v2254_v57, %v4934_v42  ;;  %v2467_v24 = vsel %vm2230_vm10, %v4934_v42, 0.0  ;;  %v4943_v12 = vadd.f32 %v3355_v18, %v1833_v37  ;;  %v1552_v52 = vadd.f32 %v4636_v5, %v1215_v9 }
 0x1e7   : > { %v2498_v39 = vadd.f32 %v2497_v13, %v2467_v24  ;;  %v2099_v58 = vpop.f32.mrf.mxu1  ;;  %v4961_v18 = vadd.s32 248, %v4638_v62  ;;  %v1839_v24 = vadd.f32 %v1838_v2, %v4634_v56  ;;  %v1544_v17 = vadd.f32 %v4640_v60, %v1208_v30  ;;  %v1850_v43 = vpop.f32.mrf.mxu0 }
 0x1e8   : > { %v2261_v57 = vmax.f32 %v2257_v63, %v4943_v12  ;;  %v2470_v32 = vsel %vm2233_vm11, %v4943_v12, 0.0  ;;  %v4955_v37 = vadd.f32 %v2099_v58, %v1827_v38  ;;  %vm2234_vm14 = vcmp.eq.s32.totalorder %v4950_v11, %v4647_v35 }
 0x1e9   : > { %v2499_v13 = vadd.f32 %v2498_v39, %v2468_v53  ;;  %v3358_v6 = vpop.f32.mrf.mxu1  ;;  %v4975_v38 = vadd.s32 240, %v4638_v62  ;;  %v1857_v56 = vadd.f32 %v3281_v33, %v1552_v52  ;;  %vm2237_vm15 = vcmp.eq.s32.totalorder %v4961_v18, %v4647_v35  ;;  %v5546_v62 = vld [vmem:[#allocation11_spill] sm:$0xff] }
 0x1ea   : > { %v2260_v48 = vmax.f32 %v2256_v51, %v4955_v37  ;;  %v2469_v63 = vsel %vm2232_vm12, %v4955_v37, 0.0  ;;  %v4969_v10 = vadd.f32 %v3358_v6, %v1845_v15  ;;  %v1851_v58 = vadd.f32 %v1850_v43, %v1544_v17 }
 0x1eb   : > { %v2500_v5 = vadd.f32 %v2499_v13, %v2469_v63  ;;  %v2111_v53 = vpop.f32.mrf.mxu1  ;;  %vm2236_vm0 = vcmp.eq.s32.totalorder %v4975_v38, %v4647_v35  ;;  %vm2182_vm11 = vcmp.eq.s32.totalorder %v4742_v27, %v4623_v0 }
 0x1ec   : > { %v2263_v51 = vmax.f32 %v2259_v59, %v4969_v10  ;;  %v2472_v2 = vsel %vm2235_vm13, %v4969_v10, 0.0  ;;  %v4982_v9 = vadd.f32 %v2111_v53, %v1839_v24  ;;  %vm2183_vm13 = vcmp.eq.s32.totalorder %v5546_v62, %v4623_v0 }
 0x1ed   : > { %v2501_v60 = vadd.f32 %v2500_v5, %v2470_v32  ;;  %v3361_v39 = vpop.f32.mrf.mxu1 }
 0x1ee   : > { %v2262_v15 = vmax.f32 %v2258_v14, %v4982_v9  ;;  %v2471_v30 = vsel %vm2234_vm14, %v4982_v9, 0.0  ;;  %v4988_v33 = vadd.f32 %v3361_v39, %v1857_v56 }
 0x1ef   : > { %v2502_v59 = vadd.f32 %v2501_v60, %v2471_v30  ;;  %v2123_v52 = vpop.f32.mrf.mxu1 }
 0x1f0   : > { %v2266_v13 = vmax.f32 %v2262_v15, %v2263_v51  ;;  %v2265_v6 = vmax.f32 %v2261_v57, %v4988_v33  ;;  %v2474_v32 = vsel %vm2237_vm15, %v4988_v33, 0.0  ;;  %v4994_v24 = vadd.f32 %v2123_v52, %v1851_v58 }
 0x1f1   : > { %v2503_v63 = vadd.f32 %v2502_v59, %v2472_v2 }
 0x1f2   : > { %v2264_v17 = vmax.f32 %v2260_v48, %v4994_v24  ;;  %v2473_v14 = vsel %vm2236_vm0, %v4994_v24, 0.0 }
 0x1f3   : > { %v2504_v43 = vadd.f32 %v2503_v63, %v2473_v14 }
 0x1f4   : > { %v2267_v5 = vmax.f32 %v2264_v17, %v2265_v6 }
 0x1f5   : > { %v4998_v53 = vadd.f32 %v2504_v43, %v2474_v32 }
 0x1f6   : > { %v2268_v56 = vmax.f32 %v2266_v13, %v2267_v5 }
 0x1f8   : > { %v2269_v60 = vrot.slane %v2268_v56, 4 }
 0x1fa   : > { %v2270_v39 = vmax.f32 %v2268_v56, %v2269_v60  ;;  %v5536_v60 = vld [vmem:[#allocation15_spill] sm:$0xff] }
 0x1fb   : > { %vm2171_vm1 = vcmp.eq.s32.totalorder %v5536_v60, %v4623_v0 }
 0x1fc   : > { %v2271_v35 = vrot.slane %v2270_v39, 2 }
 0x1fe   : > { %v2272_v51 = vmax.f32 %v2270_v39, %v2271_v35  ;;  %v5537_v39 = vld [vmem:[#allocation8_spill] sm:$0xff] }
 0x1ff   : > { %vm2173_vm2 = vcmp.eq.s32.totalorder %v5537_v39, %v4623_v0 }
 0x200   : > { %v2273_v15 = vrot.slane %v2272_v51, 1 }
 0x202   : > { %v5000_v57 = vmax.f32 %v2272_v51, %v2273_v15 }
 0x204   : > { %v2275_v58 = vsub.f32 %v4656_v16, %v5000_v57  ;;  %v2276_v48 = vsub.f32 %v4654_v55, %v5000_v57  ;;  %v2277_v2 = vsub.f32 %v4674_v23, %v5000_v57  ;;  %v2278_v30 = vsub.f32 %v4672_v61, %v5000_v57 }
 0x205   : > { %v2279_v59 = vsub.f32 %v4692_v26, %v5000_v57  ;;  %v2280_v52 = vsub.f32 %v4690_v19, %v5000_v57  ;;  %v2281_v13 = vsub.f32 %v4716_v1, %v5000_v57  ;;  %v2282_v55 = vsub.f32 %v4714_v47, %v5000_v57 }
 0x206   : > { %v2307_v6 = vmul.f32 1.442695, %v2275_v58  ;;  %v2309_v16 = vmul.f32 1.442695, %v2276_v48  ;;  %v2311_v32 = vmul.f32 1.442695, %v2277_v2  ;;  %v2283_v23 = vsub.f32 %v4736_v8, %v5000_v57 }
 0x207   : > { %v2313_v63 = vmul.f32 1.442695, %v2278_v30  ;;  %v2315_v61 = vmul.f32 1.442695, %v2279_v59  ;;  %v2284_v26 = vsub.f32 %v4734_v45, %v5000_v57  ;;  %v2317_v19 = vmul.f32 1.442695, %v2280_v52 }
 0x208   : > { %3414 = vpow2.f32 %v2307_v6  ;;  %v2285_v1 = vsub.f32 %v4765_v49, %v5000_v57  ;;  %v2319_v17 = vmul.f32 1.442695, %v2281_v13  ;;  %v2286_v14 = vsub.f32 %v4749_v3, %v5000_v57  ;;  %v5541_v30 = vld [vmem:[#allocation10_spill] sm:$0xff]  ;;  %v5542_v13 = vld [vmem:[#allocation40_spill] sm:$0xff] }
 0x209   : > { %3416 = vpow2.f32 %v2309_v16  ;;  %v2321_v47 = vmul.f32 1.442695, %v2282_v55  ;;  %v2287_v8 = vsub.f32 %v4789_v31, %v5000_v57  ;;  %v2323_v43 = vmul.f32 1.442695, %v2283_v23  ;;  %v5543_v55 = vld [vmem:[#allocation25_spill] sm:$0xff] }
 0x20a   : > { %3418 = vpow2.f32 %v2311_v32  ;;  %v2288_v45 = vsub.f32 %v4777_v25, %v5000_v57  ;;  %v2325_v5 = vmul.f32 1.442695, %v2284_v26  ;;  %v2289_v49 = vsub.f32 %v4815_v4, %v5000_v57 }
 0x20b   : > { %3420 = vpow2.f32 %v2313_v63  ;;  %v2327_v56 = vmul.f32 1.442695, %v2285_v1  ;;  %v2290_v3 = vsub.f32 %v4802_v54, %v5000_v57  ;;  %v2329_v31 = vmul.f32 1.442695, %v2286_v14  ;;  %v5538_v54 = vld [vmem:[#allocation22_spill] sm:$0xff]  ;;  %v5545_v1 = vld [vmem:[#allocation9_spill] sm:$0xff] }
 0x20c   : > { %3422 = vpow2.f32 %v2315_v61  ;;  %v2291_v25 = vsub.f32 %v4841_v50, %v5000_v57  ;;  %v2331_v35 = vmul.f32 1.442695, %v2287_v8  ;;  %v2292_v4 = vsub.f32 %v4829_v44, %v5000_v57  ;;  %v5539_v50 = vld [vmem:[#allocation29_spill] sm:$0xff]  ;;  %v5540_v44 = vld [vmem:[#allocation31_spill] sm:$0xff] }
 0x20d   : > { %3424 = vpow2.f32 %v2317_v19  ;;  %v2333_v51 = vmul.f32 1.442695, %v2288_v45  ;;  %vm2172_vm4 = vcmp.eq.s32.totalorder %v5538_v54, %v4623_v0  ;;  %v2293_v15 = vsub.f32 %v4865_v28, %v5000_v57  ;;  %v5547_v8 = vld [vmem:[#allocation43_spill] sm:$0xff]  ;;  %v5550_v54 = vld [vmem:[#allocation33_spill] sm:$0xff] }
 0x20e   : > { %3426 = vpow2.f32 %v2319_v17  ;;  %v2335_v58 = vmul.f32 1.442695, %v2289_v49  ;;  %vm2174_vm5 = vcmp.eq.s32.totalorder %v5539_v50, %v4623_v0  ;;  %v2294_v48 = vsub.f32 %v4853_v46, %v5000_v57 }
 0x20f   : > { %3428 = vpow2.f32 %v2321_v47  ;;  %v2337_v2 = vmul.f32 1.442695, %v2290_v3  ;;  %vm2175_vm6 = vcmp.eq.s32.totalorder %v5540_v44, %v4623_v0  ;;  %vm2178_vm7 = vcmp.eq.s32.totalorder %v5541_v30, %v4623_v0 }
 0x210   : > { %3430 = vpow2.f32 %v2323_v43  ;;  %v2295_v59 = vsub.f32 %v4888_v22, %v5000_v57  ;;  %v2339_v28 = vmul.f32 1.442695, %v2291_v25  ;;  %vm2180_vm8 = vcmp.eq.s32.totalorder %v5542_v13, %v4623_v0  ;;  %v5544_v22 = vld [vmem:[#allocation37_spill] sm:$0xff]  ;;  %v5549_v25 = vld [vmem:[#allocation47_spill] sm:$0xff] }
 0x211   : > { %3432 = vpow2.f32 %v2325_v5  ;;  %v2296_v46 = vsub.f32 %v4877_v21, %v5000_v57  ;;  %v2297_v6 = vsub.f32 %v4910_v7, %v5000_v57  ;;  %v2341_v16 = vmul.f32 1.442695, %v2292_v4 }
 0x212   : > { %3434 = vpow2.f32 %v2327_v56  ;;  %vm2176_vm9 = vcmp.eq.s32.totalorder %v5543_v55, %v4623_v0  ;;  %vm2181_vm10 = vcmp.eq.s32.totalorder %v5544_v22, %v4623_v0  ;;  %v2298_v63 = vsub.f32 %v4899_v36, %v5000_v57  ;;  %v5548_v56 = vld [vmem:[#allocation12_spill] sm:$0xff] }
 0x213   : > { %3436 = vpow2.f32 %v2329_v31  ;;  %v2343_v23 = vmul.f32 1.442695, %v2293_v15  ;;  %v2299_v7 = vsub.f32 %v4934_v42, %v5000_v57  ;;  %v2345_v26 = vmul.f32 1.442695, %v2294_v48 }
 0x214   : > { %3438 = vpow2.f32 %v2331_v35  ;;  %vm2177_vm12 = vcmp.eq.s32.totalorder %v5545_v1, %v4623_v0  ;;  %v2300_v17 = vsub.f32 %v4924_v29, %v5000_v57  ;;  %v2347_v14 = vmul.f32 1.442695, %v2295_v59 }
 0x215   : > { %v3415_v52 = vpop.eup %3414  ;;  %3440 = vpow2.f32 %v2333_v51  ;;  %vm2184_vm14 = vcmp.eq.s32.totalorder %v5547_v8, %v4623_v0  ;;  %v2301_v43 = vsub.f32 %v4955_v37, %v5000_v57  ;;  %v2349_v45 = vmul.f32 1.442695, %v2296_v46 }
 0x216   : > { %v3417_v32 = vpop.eup %3416  ;;  %3442 = vpow2.f32 %v2335_v58  ;;  %v2371_v21 = vsel %vm2170_vm3, 0.0, %v3415_v52  ;;  %vm2185_vm15 = vcmp.eq.s32.totalorder %v5548_v56, %v4623_v0  ;;  %v2302_v29 = vsub.f32 %v4943_v12, %v5000_v57 }
 0x217   : > { %v3419_v61 = vpop.eup %3418  ;;  %3444 = vpow2.f32 %v2337_v2  ;;  %v2372_v19 = vsel %vm2171_vm1, 0.0, %v3417_v32  ;;  %v2351_v60 = vmul.f32 1.442695, %v2297_v6  ;;  %vm2186_vm0 = vcmp.eq.s32.totalorder %v5549_v25, %v4623_v0 }
 0x218   : > { %v3421_v36 = vpop.eup %3420  ;;  %3446 = vpow2.f32 %v2339_v28  ;;  %v2403_v47 = vadd.f32 %v2372_v19, %v2371_v21  ;;  %v2373_v5 = vsel %vm2172_vm4, 0.0, %v3419_v61  ;;  %v2303_v37 = vsub.f32 %v4982_v9, %v5000_v57 }
 0x219   : > { %v3423_v42 = vpop.eup %3422  ;;  %3448 = vpow2.f32 %v2341_v16  ;;  %v2353_v35 = vmul.f32 1.442695, %v2298_v63  ;;  %v2374_v4 = vsel %vm2173_vm2, 0.0, %v3421_v36  ;;  %vm2179_vm1 = vcmp.eq.s32.totalorder %v5550_v54, %v4623_v0 }
 0x21a   : > { %v3425_v49 = vpop.eup %3424  ;;  %3450 = vpow2.f32 %v2343_v23  ;;  %v2404_v3 = vadd.f32 %v2403_v47, %v2373_v5  ;;  %v2304_v12 = vsub.f32 %v4969_v10, %v5000_v57  ;;  %v2355_v15 = vmul.f32 1.442695, %v2299_v7 }
 0x21b   : > { %v3427_v31 = vpop.eup %3426  ;;  %3452 = vpow2.f32 %v2345_v26  ;;  %v2305_v9 = vsub.f32 %v4994_v24, %v5000_v57  ;;  %v2357_v2 = vmul.f32 1.442695, %v2300_v17  ;;  %v2375_v39 = vsel %vm2174_vm5, 0.0, %v3423_v42 }
 0x21c   : > { %v3429_v51 = vpop.eup %3428  ;;  %3454 = vpow2.f32 %v2347_v14  ;;  %v2405_v58 = vadd.f32 %v2404_v3, %v2374_v4  ;;  %v2359_v28 = vmul.f32 1.442695, %v2301_v43  ;;  %v2306_v6 = vsub.f32 %v4988_v33, %v5000_v57  ;;  %v5551_v14 = vld [vmem:[#allocation14_spill] sm:$0xff]  ;;  %v5552_v43 = vld [vmem:[#allocation16_spill] sm:$0xff] }
 0x21d   : > { %v3431_v48 = vpop.eup %3430  ;;  %3456 = vpow2.f32 %v2349_v45  ;;  %v2361_v24 = vmul.f32 1.442695, %v2302_v29  ;;  %v2376_v16 = vsel %vm2175_vm6, 0.0, %v3425_v49  ;;  %v2363_v32 = vmul.f32 1.442695, %v2303_v37  ;;  %v5553_v45 = vld [vmem:[#allocation48_spill] sm:$0xff] }
 0x21e   : > { %v3433_v59 = vpop.eup %3432  ;;  %3458 = vpow2.f32 %v2351_v60  ;;  %v2379_v10 = vsel %vm2178_vm7, 0.0, %v3431_v48  ;;  %v2406_v52 = vadd.f32 %v2405_v58, %v2375_v39  ;;  %v2365_v21 = vmul.f32 1.442695, %v2304_v12  ;;  %v5554_v29 = vld [vmem:[#allocation50_spill] sm:$0xff]  ;;  %v5558_v39 = vld [vmem:[#allocation19_spill] sm:$0xff] }
 0x21f   : > { %v3435_v46 = vpop.eup %3434  ;;  %3460 = vpow2.f32 %v2353_v35  ;;  %v2377_v33 = vsel %vm2176_vm9, 0.0, %v3427_v31  ;;  %v2367_v7 = vmul.f32 1.442695, %v2305_v9  ;;  %v2369_v36 = vmul.f32 1.442695, %v2306_v6  ;;  %v5555_v31 = vld [vmem:[#allocation17_spill] sm:$0xff] }
 0x220   : > { %v3437_v50 = vpop.eup %3436  ;;  %3462 = vpow2.f32 %v2355_v15  ;;  %v2381_v63 = vsel %vm2180_vm8, 0.0, %v3435_v46  ;;  %v2407_v30 = vadd.f32 %v2406_v52, %v2376_v16  ;;  %v2378_v55 = vsel %vm2177_vm12, 0.0, %v3429_v51  ;;  %v5556_v4 = vld [vmem:[#allocation18_spill] sm:$0xff]  ;;  %v5557_v15 = vld [vmem:[#allocation52_spill] sm:$0xff] }
 0x221   : > { %v3439_v23 = vpop.eup %3438  ;;  %3464 = vpow2.f32 %v2357_v2  ;;  %v2382_v44 = vsel %vm2181_vm10, 0.0, %v3437_v50  ;;  %vm2187_vm2 = vcmp.eq.s32.totalorder %v5551_v14, %v4623_v0  ;;  %vm2188_vm3 = vcmp.eq.s32.totalorder %v5552_v43, %v4623_v0 }
 0x222   : > { %v3441_v61 = vpop.eup %3440  ;;  %3466 = vpow2.f32 %v2359_v28  ;;  %v2383_v13 = vsel %vm2182_vm11, 0.0, %v3439_v23  ;;  %v2408_v26 = vadd.f32 %v2407_v30, %v2377_v33  ;;  %vm2189_vm4 = vcmp.eq.s32.totalorder %v5553_v45, %v4623_v0 }
 0x223   : > { %v3443_v19 = vpop.eup %3442  ;;  %3468 = vpow2.f32 %v2361_v24  ;;  %v2384_v22 = vsel %vm2183_vm13, 0.0, %v3441_v61  ;;  %vm2190_vm5 = vcmp.eq.s32.totalorder %v5554_v29, %v4623_v0  ;;  %v2380_v56 = vsel %vm2179_vm1, 0.0, %v3433_v59 }
 0x224   : > { %v3445_v17 = vpop.eup %3444  ;;  %3470 = vpow2.f32 %v2363_v32  ;;  %v2385_v27 = vsel %vm2184_vm14, 0.0, %v3443_v19  ;;  %v2409_v47 = vadd.f32 %v2408_v26, %v2378_v55  ;;  %vm2191_vm6 = vcmp.eq.s32.totalorder %v5555_v31, %v4623_v0 }
 0x225   : > { %v3447_v42 = vpop.eup %3446  ;;  %3472 = vpow2.f32 %v2365_v21  ;;  %v2386_v1 = vsel %vm2185_vm15, 0.0, %v3445_v17  ;;  %vm2192_vm7 = vcmp.eq.s32.totalorder %v5556_v4, %v4623_v0  ;;  %vm2193_vm8 = vcmp.eq.s32.totalorder %v5557_v15, %v4623_v0 }
 0x226   : > { %v3449_v62 = vpop.eup %3448  ;;  %3474 = vpow2.f32 %v2367_v7  ;;  %v2387_v8 = vsel %vm2186_vm0, 0.0, %v3447_v42  ;;  %v2410_v5 = vadd.f32 %v2409_v47, %v2379_v10  ;;  %vm2194_vm9 = vcmp.eq.s32.totalorder %v4904_v40, %v4623_v0 }
 0x227   : > { %v3451_v49 = vpop.eup %3450  ;;  %3476 = vpow2.f32 %v2369_v36  ;;  %v2388_v60 = vsel %vm2187_vm2, 0.0, %v3449_v62  ;;  %vm2195_vm10 = vcmp.eq.s32.totalorder %v5558_v39, %v4623_v0  ;;  %vm2196_vm11 = vcmp.eq.s32.totalorder %v4918_v20, %v4623_v0 }
 0x228   : > { %v3453_v3 = vpop.eup %3452  ;;  %v2389_v25 = vsel %vm2188_vm3, 0.0, %v3451_v49  ;;  %v2411_v37 = vadd.f32 %v2410_v5, %v2380_v56  ;;  %vm2197_vm12 = vcmp.eq.s32.totalorder %v4915_v41, %v4623_v0  ;;  %vm2198_vm13 = vcmp.eq.s32.totalorder %v4950_v11, %v4623_v0 }
 0x229   : > { %v3455_v35 = vpop.eup %3454  ;;  %v2390_v51 = vsel %vm2189_vm4, 0.0, %v3453_v3  ;;  %vm2199_vm14 = vcmp.eq.s32.totalorder %v4929_v34, %v4623_v0  ;;  %vm2200_vm15 = vcmp.eq.s32.totalorder %v4975_v38, %v4623_v0  ;;  %vm2201_vm0 = vcmp.eq.s32.totalorder %v4961_v18, %v4623_v0 }
 0x22a   : > { %v3457_v12 = vpop.eup %3456  ;;  %v2391_v54 = vsel %vm2190_vm5, 0.0, %v3455_v35  ;;  %v2412_v58 = vadd.f32 %v2411_v37, %v2381_v63  ;;  %v2506_v29 = vrot.slane %v4998_v53, 4 }
 0x22b   : > { %v3459_v48 = vpop.eup %3458  ;;  %v2392_v9 = vsel %vm2191_vm6, 0.0, %v3457_v12 }
 0x22c   : > { %v3461_v2 = vpop.eup %3460  ;;  %v2393_v59 = vsel %vm2192_vm7, 0.0, %v3459_v48  ;;  %v2413_v28 = vadd.f32 %v2412_v58, %v2382_v44 }
 0x22d   : > { %v3463_v10 = vpop.eup %3462  ;;  %v2394_v52 = vsel %vm2193_vm8, 0.0, %v3461_v2 }
 0x22e   : > { %v3465_v46 = vpop.eup %3464  ;;  %v2395_v6 = vsel %vm2194_vm9, 0.0, %v3463_v10  ;;  %v2414_v24 = vadd.f32 %v2413_v28, %v2383_v13 }
 0x22f   : > { %v3467_v16 = vpop.eup %3466  ;;  %v2396_v40 = vsel %vm2195_vm10, 0.0, %v3465_v46 }
 0x230   : > { %v3469_v50 = vpop.eup %3468  ;;  %v2397_v32 = vsel %vm2196_vm11, 0.0, %v3467_v16  ;;  %v2415_v63 = vadd.f32 %v2414_v24, %v2384_v22 }
 0x231   : > { %v3471_v30 = vpop.eup %3470  ;;  %v2398_v20 = vsel %vm2197_vm12, 0.0, %v3469_v50 }
 0x232   : > { %v3473_v23 = vpop.eup %3472  ;;  %v2399_v41 = vsel %vm2198_vm13, 0.0, %v3471_v30  ;;  %v2416_v21 = vadd.f32 %v2415_v63, %v2385_v27 }
 0x233   : > { %v3475_v33 = vpop.eup %3474  ;;  %v2400_v11 = vsel %vm2199_vm14, 0.0, %v3473_v23 }
 0x234   : > { %v3477_v44 = vpop.eup %3476  ;;  %v2401_v61 = vsel %vm2200_vm15, 0.0, %v3475_v33  ;;  %v2417_v7 = vadd.f32 %v2416_v21, %v2386_v1 }
 0x235   : > { %v2402_v13 = vsel %vm2201_vm0, 0.0, %v3477_v44 }
 0x236   : > { %v2418_v34 = vadd.f32 %v2417_v7, %v2387_v8 }
 0x238   : > { %v2419_v26 = vadd.f32 %v2418_v34, %v2388_v60  ;;  %v2507_v60 = vadd.f32 %v2506_v29, %v4998_v53 }
 0x23a   : > { %v2420_v19 = vadd.f32 %v2419_v26, %v2389_v25  ;;  %v2508_v3 = vrot.slane %v2507_v60, 2 }
 0x23c   : > { %v2421_v36 = vadd.f32 %v2420_v19, %v2390_v51  ;;  %v2509_v31 = vadd.f32 %v2508_v3, %v2507_v60 }
 0x23e   : > { %v2422_v55 = vadd.f32 %v2421_v36, %v2391_v54  ;;  %v2510_v25 = vrot.slane %v2509_v31, 1 }
 0x240   : > { %v2423_v22 = vadd.f32 %v2422_v55, %v2392_v9  ;;  %v2511_v51 = vadd.f32 %v2510_v25, %v2509_v31 }
 0x242   : > { %v2424_v38 = vadd.f32 %v2423_v22, %v2393_v59 }
 0x244   : > { %v2425_v17 = vadd.f32 %v2424_v38, %v2394_v52 }
 0x246   : > { %v2426_v14 = vadd.f32 %v2425_v17, %v2395_v6 }
 0x248   : > { %v2427_v47 = vadd.f32 %v2426_v14, %v2396_v40 }
 0x24a   : > { %v2428_v42 = vadd.f32 %v2427_v47, %v2397_v32 }
 0x24c   : > { %v2429_v0 = vadd.f32 %v2428_v42, %v2398_v20 }
 0x24e   : > { %v2430_v18 = vadd.f32 %v2429_v0, %v2399_v41 }
 0x250   : > { %v2431_v27 = vadd.f32 %v2430_v18, %v2400_v11 }
 0x252   : > { %v2432_v43 = vadd.f32 %v2431_v27, %v2401_v61 }
 0x254   : > { %v2433_v62 = vadd.f32 %v2432_v43, %v2402_v13 }
 0x256   : > { %v2434_v1 = vrot.slane %v2433_v62, 4 }
 0x258   : > { %v2435_v45 = vadd.f32 %v2434_v1, %v2433_v62 }
 0x25a   : > { %v2436_v8 = vrot.slane %v2435_v45, 2 }
 0x25c   : > { %v2437_v5 = vadd.f32 %v2436_v8, %v2435_v45 }
 0x25e   : > { %v2438_v49 = vrot.slane %v2437_v5, 1 }
 0x260   : > { %v2439_v56 = vadd.f32 %v2438_v49, %v2437_v5 }
 0x262   : > { %3478 = vlog2.f32 %v2439_v56 }
 0x26f   : > { %v3479_v37 = vpop.eup %3478 }
 0x270   : > { %v2441_v35 = vmul.f32 0.6931472, %v3479_v37 }
 0x272   : > { %v2442_v4 = vadd.f32 %v2441_v35, %v5000_v57 }
 0x274   : > { %v2512_v12 = vsub.f32 %v2442_v4, %v2511_v51 }
 0x276   : > { %2513 = vst [vmem:[%s108_s30] sm:$0x1] %v2512_v12 }
 0x277   : > { %3519 = shalt.err (!%p3516_p13)
}
 0x278   : > { %s3520_s19 = scalar_lea.hbm %s2525_s5, 16  ;;  %s3524_s22 = scalar_lea.hbm %s5222_s1, 32 }
 0x279   : > { %p3521_p0 = scmp.ne.s32.totalorder %s2525_s5, %s3520_s19  ;;  %p3525_p3 = scmp.lt.s32.totalorder %s2525_s5, %s5222_s1 }
 0x27a   : > { %p3526_p4 = scmp.lt.s32.totalorder %s3524_s22, %s3520_s19 }
 0x27b   : > { %p3522_p1 = pnand %p3521_p0, %p3624_p5 }
 0x27c   : > { %p3527_p7 = por %p3526_p4, %p3525_p3 }
 0x27d   : > { %p3523_p2 = pneg %p3522_p1 }
 0x27f   : > { %p3528_p6 = pnand %p3527_p7, %p3523_p2 }
 0x281   : > { %3531 = shalt.err (!%p3528_p6)
}
 0x282   : > { %3366 = dma.vmem_to_hbm [thread:$0]  (%p3624_p5), %s2528_s2, 16, %s2525_s5, %s2515_s11  }
 0x283 PF: > { %p3378_p8 = scmp.ge.s32.totalorder %s3570_s9, 2  ;;  %s2539_s25 = sand.u32 1, %s3558_s6  }
 0x284   : > { %p5559_p9 = scmp.ne.s32.totalorder %s5361_s17, 0  ;;  %s2540_s26 = scalar_lea.sflag [#allocation4], %s2539_s25 }
 0x286   : > { %p3373_p10 = pnand %p3378_p8, %p5559_p9 }
 0x288   : > { %p3374_p11 = pneg %p3373_p10 }
 0x28a   : > { %3553 = dma.done.wait (%p3374_p11), %s2540_s26, 16  }
 0x28b   : > { %3555 = vsyncadd (%p3374_p11), %s2540_s26, 4294967280  ;;  %p12_p12 = scmp.ge.s32.totalorder %s3611_s12, 4   ;;  %s5560_s6 = smov %s3562_s7 }
 0x28c   : > { %s5561_s7 = smov %s3566_s8  ;;  %s5562_s8 = smov %s3622_s15 }
 0x28d   : > { %s5563_s9 = smov %s3611_s12  ;;  %14 = sbr.rel (!%p12_p12) target bundleno = 4 (0x4), region = 62 }
 0x292   :  { %2544 = vsyncpa [#allocation3], 1 }
 0x293   :  { %2546 = vsyncpa [#allocation3 + $0x1], 1 }
 0x294   :  { %2547 = vsyncpa [#allocation4], 1 }
 0x295   :  { %2549 = vsyncpa [#allocation4 + $0x1], 1 }

</bundles_post_ra>
